<compile_context>
chip_gen: v5e
topology: v5e:2x2
jax: 0.10.0
libtpu: 0.0.40
codegen_flags: <defaults>
</compile_context>

<pallas_src>
import jax
import jax.numpy as jnp
import numpy as np
from jax.experimental import pallas as pl
from jax.experimental.pallas import tpu as pltpu


# --------------------------------------------------------------------------- #
# Kernel
# --------------------------------------------------------------------------- #
def make_bvae_kernel(n_enc_layers, n_dec_layers, *, x_dim, z_dim, out_pad):
    """Build a kernel for a fixed (trace-time) layer structure.

    Ref order: x, eps,
               (enc_w, enc_b) * n_enc_layers,
               mu_w, mu_b, logvar_w, logvar_b,
               (dec_w, dec_b) * n_dec_layers,   # last one is the Sigmoid layer
               out_slab  ([TILE_B, out_pad] = x_hat | z | mu | logvar | 0-pad)
    """

    def _linear(h_f32, w_ref, b_ref):
        # bf16 x bf16 on the MXU, f32 accumulate; bias add in f32 on the VPU.
        return (
            jnp.dot(h_f32.astype(jnp.bfloat16), w_ref[...],
                    preferred_element_type=jnp.float32)
            + b_ref[...]
        )

    def kernel(*refs):
        idx = 0
        x_ref = refs[idx]; idx += 1
        eps_ref = refs[idx]; idx += 1
        enc = [(refs[idx + 2 * i], refs[idx + 2 * i + 1])
               for i in range(n_enc_layers)]
        idx += 2 * n_enc_layers
        mu_w, mu_b = refs[idx], refs[idx + 1]; idx += 2
        lv_w, lv_b = refs[idx], refs[idx + 1]; idx += 2
        dec = [(refs[idx + 2 * i], refs[idx + 2 * i + 1])
               for i in range(n_dec_layers)]
        idx += 2 * n_dec_layers
        out_ref = refs[idx]

        # ----- encoder: (Linear -> ReLU) * n_enc_layers -----
        h = x_ref[...]                       # already f32; no redundant cast
        for w, b in enc:
            h = jnp.maximum(_linear(h, w, b), 0.0)

        # ----- bottleneck heads -----
        mu = _linear(h, mu_w, mu_b)
        logvar = _linear(h, lv_w, lv_b)

        # ----- reparameterization: z = mu + exp(0.5*logvar) * eps -----
        std = jnp.exp(0.5 * logvar)          # f32 on the EUP
        z = mu + std * eps_ref[...]

        # ----- decoder: (Linear -> ReLU) * (n_dec-1), Linear -> Sigmoid -----
        d = z
        for w, b in dec[:-1]:
            d = jnp.maximum(_linear(d, w, b), 0.0)
        w_last, b_last = dec[-1]
        logits = _linear(d, w_last, b_last)
        # sigmoid: exp on EUP + approximate reciprocal on EUP (frees VALU slots)
        x_hat = pl.reciprocal(1.0 + jnp.exp(-logits), approx=True)

        # ----- single lane-dense output slab -----
        pieces = [x_hat, z, mu, logvar]
        used = x_dim + 3 * z_dim
        if out_pad > used:
            pieces.append(jnp.zeros((x_hat.shape[0], out_pad - used),
                                    jnp.float32))
        out_ref[...] = jnp.concatenate(pieces, axis=-1)

    return kernel


# --------------------------------------------------------------------------- #
# Parameter init (mimics nn.Linear's U(-1/sqrt(fan_in), 1/sqrt(fan_in)))
# --------------------------------------------------------------------------- #
def init_params(key, dims, z_dim):
    def lin(k, fan_in, fan_out):
        kw, kb = jax.random.split(k)
        bound = 1.0 / float(fan_in) ** 0.5
        w = jax.random.uniform(kw, (fan_in, fan_out), jnp.float32, -bound, bound)
        b = jax.random.uniform(kb, (1, fan_out), jnp.float32, -bound, bound)
        return w, b

    params = {"encoder": [], "decoder": []}
    for i in range(len(dims) - 1):                       # Linear + ReLU
        key, sub = jax.random.split(key)
        params["encoder"].append(lin(sub, dims[i], dims[i + 1]))
    key, sub = jax.random.split(key)
    params["mu"] = lin(sub, dims[-1], z_dim)
    key, sub = jax.random.split(key)
    params["logvar"] = lin(sub, dims[-1], z_dim)
    re_dims = list(reversed(dims + [z_dim]))
    for i in range(len(re_dims) - 2):                    # Linear + ReLU
        key, sub = jax.random.split(key)
        params["decoder"].append(lin(sub, re_dims[i], re_dims[i + 1]))
    # final layer exactly as in the PyTorch __init__: Linear(dims[-2], dims[-1])
    key, sub = jax.random.split(key)
    params["decoder"].append(lin(sub, dims[-2], dims[-1]))
    return params


# --------------------------------------------------------------------------- #
# Wrapper
# --------------------------------------------------------------------------- #
def bvae_forward(x, eps, params, dims, z_dim, tile_b=128):
    B = x.shape[0]
    in_dim = dims[0]
    x_dim = dims[-1]                       # width of x_hat (module quirk)
    out_width = x_dim + 3 * z_dim
    out_pad = ((out_width + 127) // 128) * 128   # lane-dense output slab width

    # Pad the batch up to a multiple of TILE_B (rows >= 8 for sublane tiling).
    n_tiles = pl.cdiv(B, tile_b)
    B_pad = int(n_tiles) * tile_b
    if B_pad != B:
        x = jnp.pad(x, ((0, B_pad - B), (0, 0)))
        eps = jnp.pad(eps, ((0, B_pad - B), (0, 0)))

    # Flattened inputs + BlockSpecs.  Activations are tiled by batch; weights
    # (bf16) and biases (f32) use full-array blocks with a constant index_map
    # so they stay resident in VMEM across all grid steps.
    flat_inputs = [x, eps]
    in_specs = [
        pl.BlockSpec((tile_b, in_dim), lambda i: (i, 0)),
        pl.BlockSpec((tile_b, z_dim), lambda i: (i, 0)),
    ]

    def add_wb(w, b):
        flat_inputs.append(w.astype(jnp.bfloat16))
        in_specs.append(pl.BlockSpec(w.shape, lambda i: (0, 0)))
        flat_inputs.append(b)                               # bias stays f32
        in_specs.append(pl.BlockSpec(b.shape, lambda i: (0, 0)))

    for w, b in params["encoder"]:
        add_wb(w, b)
    add_wb(*params["mu"])
    add_wb(*params["logvar"])
    for w, b in params["decoder"]:
        add_wb(w, b)

    kernel = make_bvae_kernel(
        len(params["encoder"]), len(params["decoder"]),
        x_dim=x_dim, z_dim=z_dim, out_pad=out_pad)

    # Cost estimate: matmul flops + transcendentals (exp in reparam + sigmoid).
    all_layers = (params["encoder"]
                  + [params["mu"], params["logvar"]]
                  + params["decoder"])
    flops = 2 * B_pad * sum(int(w.shape[0]) * int(w.shape[1])
                            for w, _ in all_layers)
    transcendentals = B_pad * (z_dim + x_dim)
    bytes_accessed = int(sum(a.size * a.dtype.itemsize for a in flat_inputs)
                         + B_pad * out_pad * 4)

    slab = pl.pallas_call(
        kernel,
        out_shape=jax.ShapeDtypeStruct((B_pad, out_pad), jnp.float32),
        grid_spec=pltpu.PrefetchScalarGridSpec(
            num_scalar_prefetch=0,
            grid=(int(n_tiles),),
            in_specs=in_specs,
            out_specs=pl.BlockSpec((tile_b, out_pad), lambda i: (i, 0)),
        ),
        compiler_params=pltpu.CompilerParams(
            dimension_semantics=("parallel",)),
        cost_estimate=pl.CostEstimate(
            flops=flops,
            transcendentals=transcendentals,
            bytes_accessed=bytes_accessed),
    )(*flat_inputs)

    x_hat = slab[:B, :x_dim]
    z = slab[:B, x_dim:x_dim + z_dim]
    mu = slab[:B, x_dim + z_dim:x_dim + 2 * z_dim]
    logvar = slab[:B, x_dim + 2 * z_dim:x_dim + 3 * z_dim]
    return x_hat, z, mu, logvar


# --------------------------------------------------------------------------- #
# Pure-JAX reference (f32 everywhere) for correctness checking
# --------------------------------------------------------------------------- #
def bvae_reference(x, eps, params):
    h = x
    for w, b in params["encoder"]:
        h = jnp.maximum(h @ w + b, 0.0)
    mu = h @ params["mu"][0] + params["mu"][1]
    logvar = h @ params["logvar"][0] + params["logvar"][1]
    z = mu + jnp.exp(0.5 * logvar) * eps
    d = z
    for w, b in params["decoder"][:-1]:
        d = jnp.maximum(d @ w + b, 0.0)
    w_last, b_last = params["decoder"][-1]
    x_hat = jax.nn.sigmoid(d @ w_last + b_last)
    return x_hat, z, mu, logvar


if __name__ == "__main__":
    # Small shapes consistent with the module: dims = [input_dim, hidden...].
    # Batch of 256 with TILE_B=128 exercises the grid (2 steps / megacore).
    dims = [16, 32, 64]
    z_dim = 8
    batch = 256
    TILE_B = 128

    key = jax.random.PRNGKey(0)
    k_params, k_x, k_eps = jax.random.split(key, 3)

    params = init_params(k_params, dims, z_dim)
    x = jax.random.uniform(k_x, (batch, dims[0]), jnp.float32)
    # eps ~ N(0,1) (torch.randn_like equivalent, drawn deterministically here)
    eps = jax.random.normal(k_eps, (batch, z_dim), jnp.float32)

    x_hat, z, mu, logvar = bvae_forward(x, eps, params, dims, z_dim,
                                        tile_b=TILE_B)
    jax.block_until_ready((x_hat, z, mu, logvar))

    # sanity: shapes match the PyTorch forward
    assert x_hat.shape == (batch, dims[-1])
    assert z.shape == (batch, z_dim)
    assert mu.shape == (batch, z_dim)
    assert logvar.shape == (batch, z_dim)

    # numerical sanity vs f32 reference (bf16 matmuls + approx reciprocal)
    r_xhat, r_z, r_mu, r_logvar = bvae_reference(x, eps, params)
    np.testing.assert_allclose(np.asarray(x_hat), np.asarray(r_xhat),
                               atol=5e-2, rtol=5e-2)
    np.testing.assert_allclose(np.asarray(mu), np.asarray(r_mu),
                               atol=5e-2, rtol=5e-2)
    np.testing.assert_allclose(np.asarray(logvar), np.asarray(r_logvar),
                               atol=5e-2, rtol=5e-2)
    np.testing.assert_allclose(np.asarray(z), np.asarray(r_z),
                               atol=5e-2, rtol=5e-2)

    print("KERNEL_OK")
</pallas_src>

<mosaic_0001>
module attributes {stable_mosaic.version = 11 : i64} {
  func.func @kernel(%arg0: i32, %arg1: memref<128x16xf32, #tpu.memory_space<vmem>>, %arg2: memref<128x8xf32, #tpu.memory_space<vmem>>, %arg3: memref<16x32xbf16, #tpu.memory_space<vmem>>, %arg4: memref<1x32xf32, #tpu.memory_space<vmem>>, %arg5: memref<32x64xbf16, #tpu.memory_space<vmem>>, %arg6: memref<1x64xf32, #tpu.memory_space<vmem>>, %arg7: memref<64x8xbf16, #tpu.memory_space<vmem>>, %arg8: memref<1x8xf32, #tpu.memory_space<vmem>>, %arg9: memref<64x8xbf16, #tpu.memory_space<vmem>>, %arg10: memref<1x8xf32, #tpu.memory_space<vmem>>, %arg11: memref<8x64xbf16, #tpu.memory_space<vmem>>, %arg12: memref<1x64xf32, #tpu.memory_space<vmem>>, %arg13: memref<64x32xbf16, #tpu.memory_space<vmem>>, %arg14: memref<1x32xf32, #tpu.memory_space<vmem>>, %arg15: memref<32x64xbf16, #tpu.memory_space<vmem>>, %arg16: memref<1x64xf32, #tpu.memory_space<vmem>>, %arg17: memref<128x128xf32, #tpu.memory_space<vmem>>) attributes {dimension_semantics = [#tpu.dimension_semantics<parallel>], iteration_bounds = array<i64: 2>, scalar_prefetch = 0 : i64, scratch_operands = 0 : i64, tpu.core_type = #tpu.core_type<tc>, window_params = [{transform_indices = @transform_0, window_bounds = array<i64: 128, 16>}, {transform_indices = @transform_1, window_bounds = array<i64: 128, 8>}, {pipeline_mode = #tpu.pipeline_mode<synchronous>, transform_indices = @transform_2, window_bounds = array<i64: 16, 32>}, {pipeline_mode = #tpu.pipeline_mode<synchronous>, transform_indices = @transform_3, window_bounds = array<i64: 1, 32>}, {pipeline_mode = #tpu.pipeline_mode<synchronous>, transform_indices = @transform_4, window_bounds = array<i64: 32, 64>}, {pipeline_mode = #tpu.pipeline_mode<synchronous>, transform_indices = @transform_5, window_bounds = array<i64: 1, 64>}, {pipeline_mode = #tpu.pipeline_mode<synchronous>, transform_indices = @transform_6, window_bounds = array<i64: 64, 8>}, {pipeline_mode = #tpu.pipeline_mode<synchronous>, transform_indices = @transform_7, window_bounds = array<i64: 1, 8>}, {pipeline_mode = #tpu.pipeline_mode<synchronous>, transform_indices = @transform_8, window_bounds = array<i64: 64, 8>}, {pipeline_mode = #tpu.pipeline_mode<synchronous>, transform_indices = @transform_9, window_bounds = array<i64: 1, 8>}, {pipeline_mode = #tpu.pipeline_mode<synchronous>, transform_indices = @transform_10, window_bounds = array<i64: 8, 64>}, {pipeline_mode = #tpu.pipeline_mode<synchronous>, transform_indices = @transform_11, window_bounds = array<i64: 1, 64>}, {pipeline_mode = #tpu.pipeline_mode<synchronous>, transform_indices = @transform_12, window_bounds = array<i64: 64, 32>}, {pipeline_mode = #tpu.pipeline_mode<synchronous>, transform_indices = @transform_13, window_bounds = array<i64: 1, 32>}, {pipeline_mode = #tpu.pipeline_mode<synchronous>, transform_indices = @transform_14, window_bounds = array<i64: 32, 64>}, {pipeline_mode = #tpu.pipeline_mode<synchronous>, transform_indices = @transform_15, window_bounds = array<i64: 1, 64>}, {transform_indices = @transform_16, window_bounds = array<i64: 128, 128>}]} {
    %c0 = arith.constant 0 : index
    %c0_0 = arith.constant 0 : index
    %0 = vector.load %arg1[%c0, %c0_0] : memref<128x16xf32, #tpu.memory_space<vmem>>, vector<128x16xf32>
    %1 = arith.truncf %0 : vector<128x16xf32> to vector<128x16xbf16>
    %c0_1 = arith.constant 0 : index
    %c0_2 = arith.constant 0 : index
    %2 = vector.load %arg3[%c0_1, %c0_2] : memref<16x32xbf16, #tpu.memory_space<vmem>>, vector<16x32xbf16>
    %cst = arith.constant dense<0.000000e+00> : vector<128x32xf32>
    %3 = tpu.matmul %1, %2, %cst {dimension_numbers = #tpu.dot_dimension_numbers<[1], [0], [0], [1], [0, 0, 1, 1], [], []>} : vector<128x16xbf16>, vector<16x32xbf16>, vector<128x32xf32> -> vector<128x32xf32>
    %c0_3 = arith.constant 0 : index
    %c0_4 = arith.constant 0 : index
    %4 = vector.load %arg4[%c0_3, %c0_4] : memref<1x32xf32, #tpu.memory_space<vmem>>, vector<1x32xf32>
    %5 = vector.broadcast %4 : vector<1x32xf32> to vector<128x32xf32>
    %6 = arith.addf %3, %5 : vector<128x32xf32>
    %cst_5 = arith.constant 0.000000e+00 : f32
    %7 = vector.broadcast %cst_5 : f32 to vector<128x32xf32>
    %8 = arith.maximumf %6, %7 : vector<128x32xf32>
    %9 = arith.truncf %8 : vector<128x32xf32> to vector<128x32xbf16>
    %c0_6 = arith.constant 0 : index
    %c0_7 = arith.constant 0 : index
    %10 = vector.load %arg5[%c0_6, %c0_7] : memref<32x64xbf16, #tpu.memory_space<vmem>>, vector<32x64xbf16>
    %cst_8 = arith.constant dense<0.000000e+00> : vector<128x64xf32>
    %11 = tpu.matmul %9, %10, %cst_8 {dimension_numbers = #tpu.dot_dimension_numbers<[1], [0], [0], [1], [0, 0, 1, 1], [], []>} : vector<128x32xbf16>, vector<32x64xbf16>, vector<128x64xf32> -> vector<128x64xf32>
    %c0_9 = arith.constant 0 : index
    %c0_10 = arith.constant 0 : index
    %12 = vector.load %arg6[%c0_9, %c0_10] : memref<1x64xf32, #tpu.memory_space<vmem>>, vector<1x64xf32>
    %13 = vector.broadcast %12 : vector<1x64xf32> to vector<128x64xf32>
    %14 = arith.addf %11, %13 : vector<128x64xf32>
    %cst_11 = arith.constant 0.000000e+00 : f32
    %15 = vector.broadcast %cst_11 : f32 to vector<128x64xf32>
    %16 = arith.maximumf %14, %15 : vector<128x64xf32>
    %17 = arith.truncf %16 : vector<128x64xf32> to vector<128x64xbf16>
    %c0_12 = arith.constant 0 : index
    %c0_13 = arith.constant 0 : index
    %18 = vector.load %arg7[%c0_12, %c0_13] : memref<64x8xbf16, #tpu.memory_space<vmem>>, vector<64x8xbf16>
    %cst_14 = arith.constant dense<0.000000e+00> : vector<128x8xf32>
    %19 = tpu.matmul %17, %18, %cst_14 {dimension_numbers = #tpu.dot_dimension_numbers<[1], [0], [0], [1], [0, 0, 1, 1], [], []>} : vector<128x64xbf16>, vector<64x8xbf16>, vector<128x8xf32> -> vector<128x8xf32>
    %c0_15 = arith.constant 0 : index
    %c0_16 = arith.constant 0 : index
    %20 = vector.load %arg8[%c0_15, %c0_16] : memref<1x8xf32, #tpu.memory_space<vmem>>, vector<1x8xf32>
    %21 = vector.broadcast %20 : vector<1x8xf32> to vector<128x8xf32>
    %22 = arith.addf %19, %21 : vector<128x8xf32>
    %23 = arith.truncf %16 : vector<128x64xf32> to vector<128x64xbf16>
    %c0_17 = arith.constant 0 : index
    %c0_18 = arith.constant 0 : index
    %24 = vector.load %arg9[%c0_17, %c0_18] : memref<64x8xbf16, #tpu.memory_space<vmem>>, vector<64x8xbf16>
    %cst_19 = arith.constant dense<0.000000e+00> : vector<128x8xf32>
    %25 = tpu.matmul %23, %24, %cst_19 {dimension_numbers = #tpu.dot_dimension_numbers<[1], [0], [0], [1], [0, 0, 1, 1], [], []>} : vector<128x64xbf16>, vector<64x8xbf16>, vector<128x8xf32> -> vector<128x8xf32>
    %c0_20 = arith.constant 0 : index
    %c0_21 = arith.constant 0 : index
    %26 = vector.load %arg10[%c0_20, %c0_21] : memref<1x8xf32, #tpu.memory_space<vmem>>, vector<1x8xf32>
    %27 = vector.broadcast %26 : vector<1x8xf32> to vector<128x8xf32>
    %28 = arith.addf %25, %27 : vector<128x8xf32>
    %cst_22 = arith.constant 5.000000e-01 : f32
    %29 = vector.broadcast %cst_22 : f32 to vector<128x8xf32>
    %30 = arith.mulf %29, %28 : vector<128x8xf32>
    %31 = math.exp %30 : vector<128x8xf32>
    %c0_23 = arith.constant 0 : index
    %c0_24 = arith.constant 0 : index
    %32 = vector.load %arg2[%c0_23, %c0_24] : memref<128x8xf32, #tpu.memory_space<vmem>>, vector<128x8xf32>
    %33 = arith.mulf %31, %32 : vector<128x8xf32>
    %34 = arith.addf %22, %33 : vector<128x8xf32>
    %35 = arith.truncf %34 : vector<128x8xf32> to vector<128x8xbf16>
    %c0_25 = arith.constant 0 : index
    %c0_26 = arith.constant 0 : index
    %36 = vector.load %arg11[%c0_25, %c0_26] : memref<8x64xbf16, #tpu.memory_space<vmem>>, vector<8x64xbf16>
    %cst_27 = arith.constant dense<0.000000e+00> : vector<128x64xf32>
    %37 = tpu.matmul %35, %36, %cst_27 {dimension_numbers = #tpu.dot_dimension_numbers<[1], [0], [0], [1], [0, 0, 1, 1], [], []>} : vector<128x8xbf16>, vector<8x64xbf16>, vector<128x64xf32> -> vector<128x64xf32>
    %c0_28 = arith.constant 0 : index
    %c0_29 = arith.constant 0 : index
    %38 = vector.load %arg12[%c0_28, %c0_29] : memref<1x64xf32, #tpu.memory_space<vmem>>, vector<1x64xf32>
    %39 = vector.broadcast %38 : vector<1x64xf32> to vector<128x64xf32>
    %40 = arith.addf %37, %39 : vector<128x64xf32>
    %cst_30 = arith.constant 0.000000e+00 : f32
    %41 = vector.broadcast %cst_30 : f32 to vector<128x64xf32>
    %42 = arith.maximumf %40, %41 : vector<128x64xf32>
    %43 = arith.truncf %42 : vector<128x64xf32> to vector<128x64xbf16>
    %c0_31 = arith.constant 0 : index
    %c0_32 = arith.constant 0 : index
    %44 = vector.load %arg13[%c0_31, %c0_32] : memref<64x32xbf16, #tpu.memory_space<vmem>>, vector<64x32xbf16>
    %cst_33 = arith.constant dense<0.000000e+00> : vector<128x32xf32>
    %45 = tpu.matmul %43, %44, %cst_33 {dimension_numbers = #tpu.dot_dimension_numbers<[1], [0], [0], [1], [0, 0, 1, 1], [], []>} : vector<128x64xbf16>, vector<64x32xbf16>, vector<128x32xf32> -> vector<128x32xf32>
    %c0_34 = arith.constant 0 : index
    %c0_35 = arith.constant 0 : index
    %46 = vector.load %arg14[%c0_34, %c0_35] : memref<1x32xf32, #tpu.memory_space<vmem>>, vector<1x32xf32>
    %47 = vector.broadcast %46 : vector<1x32xf32> to vector<128x32xf32>
    %48 = arith.addf %45, %47 : vector<128x32xf32>
    %cst_36 = arith.constant 0.000000e+00 : f32
    %49 = vector.broadcast %cst_36 : f32 to vector<128x32xf32>
    %50 = arith.maximumf %48, %49 : vector<128x32xf32>
    %51 = arith.truncf %50 : vector<128x32xf32> to vector<128x32xbf16>
    %c0_37 = arith.constant 0 : index
    %c0_38 = arith.constant 0 : index
    %52 = vector.load %arg15[%c0_37, %c0_38] : memref<32x64xbf16, #tpu.memory_space<vmem>>, vector<32x64xbf16>
    %cst_39 = arith.constant dense<0.000000e+00> : vector<128x64xf32>
    %53 = tpu.matmul %51, %52, %cst_39 {dimension_numbers = #tpu.dot_dimension_numbers<[1], [0], [0], [1], [0, 0, 1, 1], [], []>} : vector<128x32xbf16>, vector<32x64xbf16>, vector<128x64xf32> -> vector<128x64xf32>
    %c0_40 = arith.constant 0 : index
    %c0_41 = arith.constant 0 : index
    %54 = vector.load %arg16[%c0_40, %c0_41] : memref<1x64xf32, #tpu.memory_space<vmem>>, vector<1x64xf32>
    %55 = vector.broadcast %54 : vector<1x64xf32> to vector<128x64xf32>
    %56 = arith.addf %53, %55 : vector<128x64xf32>
    %cst_42 = arith.constant 0.000000e+00 : f32
    %57 = vector.broadcast %cst_42 : f32 to vector<128x64xf32>
    %58 = arith.subf %57, %56 : vector<128x64xf32>
    %59 = math.exp %58 : vector<128x64xf32>
    %cst_43 = arith.constant 1.000000e+00 : f32
    %60 = vector.broadcast %cst_43 : f32 to vector<128x64xf32>
    %61 = arith.addf %60, %59 : vector<128x64xf32>
    %62 = tpu.reciprocal %61 {approx = true} : vector<128x64xf32> -> vector<128x64xf32>
    %cst_44 = arith.constant 0.000000e+00 : f32
    %63 = vector.broadcast %cst_44 : f32 to vector<128x40xf32>
    %64 = tpu.concatenate %62, %34, %22, %28, %63 in 1 : vector<128x64xf32>, vector<128x8xf32>, vector<128x8xf32>, vector<128x8xf32>, vector<128x40xf32> -> vector<128x128xf32>
    %c0_45 = arith.constant 0 : index
    %c0_46 = arith.constant 0 : index
    %65 = vector.load %arg17[%c0_45, %c0_46] : memref<128x128xf32, #tpu.memory_space<vmem>>, vector<128x128xf32>
    tpu.vector_store %arg17[%c0_45, %c0_46], %64 {strides = array<i32>} : memref<128x128xf32, #tpu.memory_space<vmem>>, vector<128x128xf32>,
    return
  }
  func.func @transform_0(%arg0: i32) -> (i32, i32) {
    %c0_i32 = arith.constant 0 : i32
    %c0_i32_0 = arith.constant 0 : i32
    return %arg0, %c0_i32 : i32, i32
  }
  func.func @transform_1(%arg0: i32) -> (i32, i32) {
    %c0_i32 = arith.constant 0 : i32
    %c0_i32_0 = arith.constant 0 : i32
    return %arg0, %c0_i32 : i32, i32
  }
  func.func @transform_2(%arg0: i32) -> (i32, i32) {
    %c0_i32 = arith.constant 0 : i32
    %c0_i32_0 = arith.constant 0 : i32
    %c0_i32_1 = arith.constant 0 : i32
    return %c0_i32, %c0_i32_0 : i32, i32
  }
  func.func @transform_3(%arg0: i32) -> (i32, i32) {
    %c0_i32 = arith.constant 0 : i32
    %c0_i32_0 = arith.constant 0 : i32
    %c0_i32_1 = arith.constant 0 : i32
    return %c0_i32, %c0_i32_0 : i32, i32
  }
  func.func @transform_4(%arg0: i32) -> (i32, i32) {
    %c0_i32 = arith.constant 0 : i32
    %c0_i32_0 = arith.constant 0 : i32
    %c0_i32_1 = arith.constant 0 : i32
    return %c0_i32, %c0_i32_0 : i32, i32
  }
  func.func @transform_5(%arg0: i32) -> (i32, i32) {
    %c0_i32 = arith.constant 0 : i32
    %c0_i32_0 = arith.constant 0 : i32
    %c0_i32_1 = arith.constant 0 : i32
    return %c0_i32, %c0_i32_0 : i32, i32
  }
  func.func @transform_6(%arg0: i32) -> (i32, i32) {
    %c0_i32 = arith.constant 0 : i32
    %c0_i32_0 = arith.constant 0 : i32
    %c0_i32_1 = arith.constant 0 : i32
    return %c0_i32, %c0_i32_0 : i32, i32
  }
  func.func @transform_7(%arg0: i32) -> (i32, i32) {
    %c0_i32 = arith.constant 0 : i32
    %c0_i32_0 = arith.constant 0 : i32
    %c0_i32_1 = arith.constant 0 : i32
    return %c0_i32, %c0_i32_0 : i32, i32
  }
  func.func @transform_8(%arg0: i32) -> (i32, i32) {
    %c0_i32 = arith.constant 0 : i32
    %c0_i32_0 = arith.constant 0 : i32
    %c0_i32_1 = arith.constant 0 : i32
    return %c0_i32, %c0_i32_0 : i32, i32
  }
  func.func @transform_9(%arg0: i32) -> (i32, i32) {
    %c0_i32 = arith.constant 0 : i32
    %c0_i32_0 = arith.constant 0 : i32
    %c0_i32_1 = arith.constant 0 : i32
    return %c0_i32, %c0_i32_0 : i32, i32
  }
  func.func @transform_10(%arg0: i32) -> (i32, i32) {
    %c0_i32 = arith.constant 0 : i32
    %c0_i32_0 = arith.constant 0 : i32
    %c0_i32_1 = arith.constant 0 : i32
    return %c0_i32, %c0_i32_0 : i32, i32
  }
  func.func @transform_11(%arg0: i32) -> (i32, i32) {
    %c0_i32 = arith.constant 0 : i32
    %c0_i32_0 = arith.constant 0 : i32
    %c0_i32_1 = arith.constant 0 : i32
    return %c0_i32, %c0_i32_0 : i32, i32
  }
  func.func @transform_12(%arg0: i32) -> (i32, i32) {
    %c0_i32 = arith.constant 0 : i32
    %c0_i32_0 = arith.constant 0 : i32
    %c0_i32_1 = arith.constant 0 : i32
    return %c0_i32, %c0_i32_0 : i32, i32
  }
  func.func @transform_13(%arg0: i32) -> (i32, i32) {
    %c0_i32 = arith.constant 0 : i32
    %c0_i32_0 = arith.constant 0 : i32
    %c0_i32_1 = arith.constant 0 : i32
    return %c0_i32, %c0_i32_0 : i32, i32
  }
  func.func @transform_14(%arg0: i32) -> (i32, i32) {
    %c0_i32 = arith.constant 0 : i32
    %c0_i32_0 = arith.constant 0 : i32
    %c0_i32_1 = arith.constant 0 : i32
    return %c0_i32, %c0_i32_0 : i32, i32
  }
  func.func @transform_15(%arg0: i32) -> (i32, i32) {
    %c0_i32 = arith.constant 0 : i32
    %c0_i32_0 = arith.constant 0 : i32
    %c0_i32_1 = arith.constant 0 : i32
    return %c0_i32, %c0_i32_0 : i32, i32
  }
  func.func @transform_16(%arg0: i32) -> (i32, i32) {
    %c0_i32 = arith.constant 0 : i32
    %c0_i32_0 = arith.constant 0 : i32
    return %arg0, %c0_i32 : i32, i32
  }
}

</mosaic_0001>

<bundles_post_ra>
// kernel: tpu_custom_call.1
= control target key start
LH: loop header
LB: loop body
LE: loop exit
PB: predicated region body
PF: predicated region fallthrough
CT: control target
= control target key end

     0   :  { %s2955_s0 = inlined_call_operand.vmem [shape: f32[256,16], index: 0, kind: input, shape index: {}]   ;;  %s2956_s1 = inlined_call_operand.vmem [shape: f32[256,8], index: 1, kind: input, shape index: {}]   ;;  %s2957_s2 = inlined_call_operand.vmem [shape: bf16[16,32], index: 2, kind: input, shape index: {}]   ;;  %s2958_s3 = inlined_call_operand.vmem [shape: f32[1,32], index: 3, kind: input, shape index: {}]   ;;  %s2959_s4 = inlined_call_operand.vmem [shape: bf16[32,64], index: 4, kind: input, shape index: {}]   ;;  %s2960_s5 = inlined_call_operand.vmem [shape: f32[1,64], index: 5, kind: input, shape index: {}]   ;;  %s2961_s6 = inlined_call_operand.vmem [shape: bf16[64,8], index: 6, kind: input, shape index: {}]   ;;  %s2962_s7 = inlined_call_operand.vmem [shape: f32[1,8], index: 7, kind: input, shape index: {}]   ;;  %s2963_s8 = inlined_call_operand.vmem [shape: bf16[64,8], index: 8, kind: input, shape index: {}]   ;;  %s2964_s9 = inlined_call_operand.vmem [shape: f32[1,8], index: 9, kind: input, shape index: {}]   ;;  %s2965_s10 = inlined_call_operand.vmem [shape: bf16[8,64], index: 10, kind: input, shape index: {}]   ;;  %s2966_s11 = inlined_call_operand.vmem [shape: f32[1,64], index: 11, kind: input, shape index: {}]   ;;  %s2967_s12 = inlined_call_operand.vmem [shape: bf16[64,32], index: 12, kind: input, shape index: {}]   ;;  %s2968_s13 = inlined_call_operand.vmem [shape: f32[1,32], index: 13, kind: input, shape index: {}]   ;;  %s2969_s14 = inlined_call_operand.vmem [shape: bf16[32,64], index: 14, kind: input, shape index: {}]   ;;  %s2970_s15 = inlined_call_operand.vmem [shape: f32[1,64], index: 15, kind: input, shape index: {}]   ;;  %s2971_s16 = inlined_call_operand.hbm [shape: f32[256,128], index: 16, kind: output, shape index: {}]  }
   0x1   :  { %2974 = sst [smem:[#allocation7_spill]] %s2955_s0 }
   0x2   :  { %2975 = sst [smem:[#allocation8_spill]] %s2956_s1 }
   0x3   :  { %2976 = sst [smem:[#allocation9_spill]] %s2957_s2 }
   0x4   :  { %2977 = sst [smem:[#allocation10_spill]] %s2958_s3 }
   0x5   :  { %21 = vsyncpa [#allocation3], 0 }
   0x6   :  { %23 = vsyncpa [#allocation3 + $0x1], 0  ;;  %s2339_s21 = smov 0   ;;  %s2341_s22 = smov 0  }
   0x7   :  { %s2343_s23 = smov 0   ;;  %s2345_s24 = smov 0  }
   0x8 LB: > { %2978 = sst [smem:[#allocation5_spill]] %s2243_s23  ;;  %s2360_s25 = sadd.s32 4294967295, %s2247_s24   ;;  %s2247_s24 = sphi %s2345_s24, %s2991_s24   ;;  %s2243_s23 = sphi %s2343_s23, %s2988_s23   ;;  %s2239_s22 = sphi %s2341_s22, %s2990_s22   ;;  %s2235_s21 = sphi %s2339_s21, %s2989_s21  }
   0x9   : > { %s1875_s26 = sadd.s32 4294967294, %s2247_s24   ;;  %s2364_s27 = sadd.s32 1, %s2247_s24  }
   0xa   : > { %s382_s28 = sadd.s32 1, %s2243_s23  ;;  %s379_s29 = ssub.s32 %s2247_s24, %s2364_s27 }
   0xb   : > { %p392_p0 = scmp.ne.s32.totalorder %s2243_s23, %s2239_s22  ;;  %p380_p1 = scmp.eq.s32.totalorder %s379_s29, 0 }
   0xc   : > { %p393_p2 = scmp.eq.s32.totalorder %s2360_s25, 1  ;;  %p398_p3 = scmp.ne.s32.totalorder %s2239_s22, %s2235_s21 }
   0xd   : > { %p399_p4 = scmp.eq.s32.totalorder %s1875_s26, 1  ;;  %p1878_p7 = scmp.ge.s32.totalorder %s2247_s24, 1 }
   0xe   : > { %s2375_s30 = scalar_select %p380_p1, %s2243_s23, %s382_s28  }
   0xf   : > { %p2377_p5 = por %p393_p2, %p392_p0  ;;  %p2381_p6 = por %p399_p4, %p398_p3 }
  0x10   : > { %2979 = sst [smem:[#allocation6_spill]] %s2375_s30  ;;  %p477_p8 = scmp.lt.s32.totalorder %s2247_s24, 3 }
  0x12   : > { %p478_p9 = pnand %p1878_p7, %p477_p8 }
  0x13   : > { %s2982_s2 = sld [smem:[#allocation9_spill]] (!%p478_p9)  ;;  %s1880_s20 = sshll.u32 (!%p478_p9), %s2360_s25, 4 }
  0x14   : > { %481 = sbr.rel (%p478_p9) target bundleno = 1166 (0x48e), region = 84  ;;  %p533_p10 = scmp.lt.s32.totalorder (!%p478_p9), %s1880_s20, 31 }
  0x15   : > { %s2983_s30 = sld [smem:[#allocation7_spill]] (!%p478_p9)  ;;  %s2249_s29 = smov (!%p478_p9), 72  }
  0x16   : > { %s2984_s3 = sld [smem:[#allocation10_spill]] (!%p478_p9)  ;;  %s2250_s19 = smov (!%p478_p9), 80  }
  0x17   : > { %s2986_s1 = sld [smem:[#allocation8_spill]] (!%p478_p9) }
  0x19   : > { %v2013_v0 = vld [vmem:[%s2982_s2] sm:$0xff]  ;;  %s2993_s20 = smov (!%p533_p10, %s1880_s20), 31  ;;  %vm582_vm0 = vcmask 130048   ;;  %v2015_v25 = vld [vmem:[%s2959_s4 + $0x8] sm:$0xff]  ;;  %vm700_vm1 = vcmask 261120   ;;  %vm834_vm2 = vcmask 523264  }
  0x1a   : > { %614 = vmatpush.bf16.msra.mxu0 %v2013_v0  ;;  %2031 = vmatpush.bf16.msra.mxu3 %v2013_v0  ;;  %s2973_s26 = sshll.u32 %s2993_s20, 3  ;;  %v2014_v26 = vld [vmem:[%s2959_s4] sm:$0xff]  ;;  %vm1127_vm3 = vcmask 1043456   ;;  %s2985_s28 = sshll.u32 %s2993_s20, 3  ;;  %vm1102_vm4 = vcmask 64512   ;;  %vm1718_vm5 = vcmask 588800  }
  0x1b   : > { %s2399_s23 = scalar_lea.vmem %s2983_s30, %s2973_s26  ;;  %731 = vmatpush.bf16.msra.mxu1 %v2015_v25  ;;  %s2251_s20 = smov 64   ;;  %vm1735_vm6 = vcmask 654336   ;;  %vm1752_vm7 = vcmask 719872  }
  0x1c   : > { %v546_v1 = vld [vmem:[%s2399_s23] sm:$0xff]  ;;  %v547_v2 = vld [vmem:[%s2399_s23 + $0x8] sm:$0xff]  ;;  %v548_v4 = vld [vmem:[%s2399_s23 + $0x10] sm:$0xff]  ;;  %s2030_s30 = sshll.u32 %s2360_s25, 7 }
  0x1d   : > { %v562_v3 = vpack.c.bf16 %v547_v2, %v546_v1  ;;  %v549_v5 = vld [vmem:[%s2399_s23 + $0x18] sm:$0xff]  ;;  %v550_v7 = vld [vmem:[%s2399_s23 + $0x20] sm:$0xff]  ;;  %v551_v8 = vld [vmem:[%s2399_s23 + $0x28] sm:$0xff] }
  0x1e   : > { %v563_v6 = vpack.c.bf16 %v549_v5, %v548_v4  ;;  %v564_v9 = vpack.c.bf16 %v551_v8, %v550_v7  ;;  %v552_v10 = vld [vmem:[%s2399_s23 + $0x30] sm:$0xff]  ;;  %v553_v11 = vld [vmem:[%s2399_s23 + $0x38] sm:$0xff]  ;;  %v554_v13 = vld [vmem:[%s2399_s23 + $0x40] sm:$0xff]  ;;  %2032 = vmatpush.bf16.msrb.mxu3 %v2015_v25 }
  0x1f   : > { %1888 = vmatmul.msk.bf16.vlgmr.msra.gmra.mxu0 %vm582_vm0, %v562_v3  ;;  %v565_v12 = vpack.c.bf16 %v553_v11, %v552_v10  ;;  %v555_v14 = vld [vmem:[%s2399_s23 + $0x48] sm:$0xff]  ;;  %v560_v16 = vld [vmem:[%s2399_s23 + $0x70] sm:$0xff]  ;;  %v561_v17 = vld [vmem:[%s2399_s23 + $0x78] sm:$0xff]  ;;  %732 = vmatpush.bf16.msra.mxu1 %v2014_v26 }
  0x20   : > { %v566_v15 = vpack.c.bf16 %v555_v14, %v554_v13  ;;  %v569_v18 = vpack.c.bf16 %v561_v17, %v560_v16  ;;  %v556_v19 = vld [vmem:[%s2399_s23 + $0x50] sm:$0xff]  ;;  %v557_v20 = vld [vmem:[%s2399_s23 + $0x58] sm:$0xff]  ;;  %v558_v22 = vld [vmem:[%s2399_s23 + $0x60] sm:$0xff] }
  0x21   : > { %v567_v21 = vpack.c.bf16 %v557_v20, %v556_v19  ;;  %v559_v23 = vld [vmem:[%s2399_s23 + $0x68] sm:$0xff]  ;;  %v2434_v28 = vld [vmem:[%s2984_s3] ss:$0 sm:$0xff]  ;;  %v2019_v11 = vld [vmem:[%s2961_s6 + $0x18] sm:$0xff]  ;;  %s1797_s23 = scalar_lea.hbm %s2971_s16, %s2030_s30 }
  0x22   : > { %1895 = vmatmul.msk.bf16.vlgmr.msra.gmra.mxu3 %vm582_vm0, %v569_v18  ;;  %v568_v24 = vpack.c.bf16 %v559_v23, %v558_v22  ;;  %863 = vmatpush.bf16.msra.mxu2 %v2019_v11  ;;  %v2017_v17 = vld [vmem:[%s2961_s6 + $0x8] sm:$0xff]  ;;  %v2016_v20 = vld [vmem:[%s2961_s6] sm:$0xff] }
  0x23   : > { %2033 = vmatpush.bf16.msrb.mxu3 %v2014_v26  ;;  %v2475_v25 = vld [vmem:[%s2960_s5] ss:$0 sm:$0xff] }
  0x27   : > { %2034 = vmatpush.bf16.msra.mxu3 %v2019_v11 }
  0x2f   : > { %1889 = vmatmul.msk.bf16.gmra.mxu0 %vm582_vm0, %v563_v6 }
  0x3f   : > { %1890 = vmatmul.msk.bf16.gmra.mxu0 %vm582_vm0, %v564_v9 }
  0x4f   : > { %1891 = vmatmul.msk.bf16.gmra.mxu0 %vm582_vm0, %v565_v12 }
  0x5f   : > { %1892 = vmatmul.msk.bf16.gmra.mxu0 %vm582_vm0, %v566_v15  ;;  %v2018_v15 = vld [vmem:[%s2961_s6 + $0x10] sm:$0xff] }
  0x60   : > { %864 = vmatpush.bf16.msra.mxu2 %v2018_v15  ;;  %2035 = vmatpush.bf16.msra.mxu3 %v2018_v15 }
  0x64   : > { %865 = vmatpush.bf16.msra.mxu2 %v2017_v17  ;;  %2036 = vmatpush.bf16.msra.mxu3 %v2017_v17 }
  0x68   : > { %866 = vmatpush.bf16.msra.mxu2 %v2016_v20  ;;  %2037 = vmatpush.bf16.msra.mxu3 %v2016_v20 }
  0x6f   : > { %1893 = vmatmul.msk.bf16.gmra.mxu0 %vm582_vm0, %v567_v21 }
  0x7f   : > { %1894 = vmatmul.msk.bf16.gmra.mxu0 %vm582_vm0, %v568_v24 }
  0x9c   : > { %v616_v27 = vpop.f32.mrf.mxu0 }
  0x9d   : > { %v617_v29 = vadd.f32 %v2434_v28, %v616_v27 }
  0x9f   : > { %v656_v32 = vmax.f32 %v617_v29, 0.0 }
  0xa4   : > { %v618_v30 = vpop.f32.mrf.mxu0 }
  0xa5   : > { %v619_v31 = vadd.f32 %v2434_v28, %v618_v30  ;;  %v651_v9 = vpop.f32.mrf.mxu3 }
  0xa6   : > { %v652_v18 = vadd.f32 %v2434_v28, %v651_v9 }
  0xa7   : > { %v657_v33 = vmax.f32 %v619_v31, 0.0 }
  0xa8   : > { %v670_v21 = vmax.f32 %v652_v18, 0.0 }
  0xa9   : > { %v672_v34 = vpack.c.bf16 %v657_v33, %v656_v32 }
  0xab   : > { %1904 = vmatmul.msk.bf16.vlgmr.msra.gmra.mxu1 %vm700_vm1, %v672_v34 }
  0xac   : > { %v621_v35 = vpop.f32.mrf.mxu0 }
  0xad   : > { %v622_v36 = vadd.f32 %v2434_v28, %v621_v35  ;;  %v653_v16 = vpop.f32.mrf.mxu3 }
  0xae   : > { %v654_v19 = vadd.f32 %v2434_v28, %v653_v16 }
  0xaf   : > { %v658_v39 = vmax.f32 %v622_v36, 0.0 }
  0xb0   : > { %v671_v22 = vmax.f32 %v654_v19, 0.0 }
  0xb2   : > { %v679_v23 = vpack.c.bf16 %v671_v22, %v670_v21  ;;  %v2084_v21 = vld [vmem:[%s2962_s7] ss:$0 sm:$0xff] }
  0xb4   : > { %v623_v37 = vpop.f32.mrf.mxu0 }
  0xb5   : > { %v624_v38 = vadd.f32 %v2434_v28, %v623_v37 }
  0xb7   : > { %v659_v40 = vmax.f32 %v624_v38, 0.0 }
  0xb9   : > { %v673_v41 = vpack.c.bf16 %v659_v40, %v658_v39 }
  0xbb   : > { %1905 = vmatmul.msk.bf16.gmra.mxu1 %vm700_vm1, %v673_v41 }
  0xbc   : > { %v626_v42 = vpop.f32.mrf.mxu0 }
  0xbd   : > { %v627_v43 = vadd.f32 %v2434_v28, %v626_v42 }
  0xbf   : > { %v660_v46 = vmax.f32 %v627_v43, 0.0 }
  0xc4   : > { %v628_v44 = vpop.f32.mrf.mxu0 }
  0xc5   : > { %v629_v45 = vadd.f32 %v2434_v28, %v628_v44 }
  0xc7   : > { %v661_v47 = vmax.f32 %v629_v45, 0.0 }
  0xc9   : > { %v674_v48 = vpack.c.bf16 %v661_v47, %v660_v46 }
  0xcb   : > { %1906 = vmatmul.msk.bf16.gmra.mxu1 %vm700_vm1, %v674_v48 }
  0xcc   : > { %v631_v49 = vpop.f32.mrf.mxu0 }
  0xcd   : > { %v632_v50 = vadd.f32 %v2434_v28, %v631_v49 }
  0xcf   : > { %v662_v53 = vmax.f32 %v632_v50, 0.0 }
  0xd4   : > { %v633_v51 = vpop.f32.mrf.mxu0 }
  0xd5   : > { %v634_v52 = vadd.f32 %v2434_v28, %v633_v51 }
  0xd7   : > { %v663_v54 = vmax.f32 %v634_v52, 0.0 }
  0xd9   : > { %v675_v55 = vpack.c.bf16 %v663_v54, %v662_v53 }
  0xdb   : > { %1907 = vmatmul.msk.bf16.gmra.mxu1 %vm700_vm1, %v675_v55 }
  0xdc   : > { %v636_v56 = vpop.f32.mrf.mxu0 }
  0xdd   : > { %v637_v57 = vadd.f32 %v2434_v28, %v636_v56 }
  0xdf   : > { %v664_v60 = vmax.f32 %v637_v57, 0.0 }
  0xe4   : > { %v638_v58 = vpop.f32.mrf.mxu0 }
  0xe5   : > { %v639_v59 = vadd.f32 %v2434_v28, %v638_v58 }
  0xe7   : > { %v665_v61 = vmax.f32 %v639_v59, 0.0 }
  0xe9   : > { %v676_v62 = vpack.c.bf16 %v665_v61, %v664_v60  ;;  %v2023_v61 = vld [vmem:[%s2963_s8 + $0x18] sm:$0xff] }
  0xeb   : > { %1908 = vmatmul.msk.bf16.gmra.mxu1 %vm700_vm1, %v676_v62 }
  0xec   : > { %v641_v63 = vpop.f32.mrf.mxu0 }
  0xed   : > { %v642_v0 = vadd.f32 %v2434_v28, %v641_v63 }
  0xef   : > { %v666_v3 = vmax.f32 %v642_v0, 0.0 }
  0xf4   : > { %v643_v1 = vpop.f32.mrf.mxu0 }
  0xf5   : > { %v644_v2 = vadd.f32 %v2434_v28, %v643_v1  ;;  %v2022_v1 = vld [vmem:[%s2963_s8 + $0x10] sm:$0xff] }
  0xf7   : > { %v667_v4 = vmax.f32 %v644_v2, 0.0 }
  0xf9   : > { %v677_v5 = vpack.c.bf16 %v667_v4, %v666_v3 }
  0xfb   : > { %1909 = vmatmul.msk.bf16.gmra.mxu1 %vm700_vm1, %v677_v5  ;;  %v2021_v5 = vld [vmem:[%s2963_s8 + $0x8] sm:$0xff] }
  0xfc   : > { %v646_v6 = vpop.f32.mrf.mxu0 }
  0xfd   : > { %v647_v7 = vadd.f32 %v2434_v28, %v646_v6 }
  0xff   : > { %v668_v12 = vmax.f32 %v647_v7, 0.0  ;;  %v2020_v7 = vld [vmem:[%s2963_s8] sm:$0xff] }
 0x104   : > { %v648_v8 = vpop.f32.mrf.mxu0 }
 0x105   : > { %v649_v10 = vadd.f32 %v2434_v28, %v648_v8 }
 0x107   : > { %v669_v13 = vmax.f32 %v649_v10, 0.0 }
 0x109   : > { %v678_v14 = vpack.c.bf16 %v669_v13, %v668_v12 }
 0x10b   : > { %1910 = vmatmul.msk.bf16.vlgmr.msrb.gmra.mxu3 %vm700_vm1, %v678_v14 }
 0x10c   : > { %948 = vmatpush.bf16.msrb.mxu3 %v2023_v61 }
 0x110   : > { %949 = vmatpush.bf16.msrb.mxu3 %v2022_v1 }
 0x114   : > { %950 = vmatpush.bf16.msrb.mxu3 %v2021_v5 }
 0x118   : > { %951 = vmatpush.bf16.msrb.mxu3 %v2020_v7 }
 0x11b   : > { %1911 = vmatmul.msk.bf16.gmra.mxu3 %vm700_vm1, %v679_v23 }
 0x128   : > { %v734_v24 = vpop.f32.mrf.mxu1 }
 0x129   : > { %v735_v26 = vadd.f32 %v2475_v25, %v734_v24 }
 0x12b   : > { %v774_v29 = vmax.f32 %v735_v26, 0.0 }
 0x130   : > { %v736_v27 = vpop.f32.mrf.mxu1 }
 0x131   : > { %v737_v28 = vadd.f32 %v2475_v25, %v736_v27 }
 0x133   : > { %v775_v30 = vmax.f32 %v737_v28, 0.0  ;;  %v1097_v28 = vld [vmem:[%s2965_s10] sm:$0xf] }
 0x135   : > { %v2479_v31 = vpack.c.bf16 %v775_v30, %v774_v29  ;;  %v1129_v29 = vsel %vm1127_vm3, %v1097_v28, 0 }
 0x136   : > { %1138 = vmatpush.bf16.msrb.mxu0 %v1129_v29 }
 0x137   : > { %1928 = vmatmul.msk.bf16.vlgmr.msra.gmra.mxu2 %vm834_vm2, %v2479_v31 }
 0x138   : > { %v739_v32 = vpop.f32.mrf.mxu1 }
 0x139   : > { %v740_v33 = vadd.f32 %v2475_v25, %v739_v32 }
 0x13b   : > { %v776_v36 = vmax.f32 %v740_v33, 0.0 }
 0x140   : > { %v741_v34 = vpop.f32.mrf.mxu1 }
 0x141   : > { %v742_v35 = vadd.f32 %v2475_v25, %v741_v34 }
 0x143   : > { %v777_v37 = vmax.f32 %v742_v35, 0.0 }
 0x145   : > { %v2485_v38 = vpack.c.bf16 %v777_v37, %v776_v36 }
 0x147   : > { %1929 = vmatmul.msk.bf16.gmra.mxu2 %vm834_vm2, %v2485_v38 }
 0x148   : > { %v744_v39 = vpop.f32.mrf.mxu1 }
 0x149   : > { %v745_v40 = vadd.f32 %v2475_v25, %v744_v39 }
 0x14b   : > { %v778_v43 = vmax.f32 %v745_v40, 0.0 }
 0x150   : > { %v746_v41 = vpop.f32.mrf.mxu1 }
 0x151   : > { %v747_v42 = vadd.f32 %v2475_v25, %v746_v41 }
 0x153   : > { %v779_v44 = vmax.f32 %v747_v42, 0.0 }
 0x155   : > { %v2491_v45 = vpack.c.bf16 %v779_v44, %v778_v43 }
 0x157   : > { %1930 = vmatmul.msk.bf16.gmra.mxu2 %vm834_vm2, %v2491_v45 }
 0x158   : > { %v749_v46 = vpop.f32.mrf.mxu1 }
 0x159   : > { %v750_v47 = vadd.f32 %v2475_v25, %v749_v46 }
 0x15b   : > { %v780_v50 = vmax.f32 %v750_v47, 0.0 }
 0x160   : > { %v751_v48 = vpop.f32.mrf.mxu1 }
 0x161   : > { %v752_v49 = vadd.f32 %v2475_v25, %v751_v48 }
 0x163   : > { %v781_v51 = vmax.f32 %v752_v49, 0.0 }
 0x165   : > { %v2497_v52 = vpack.c.bf16 %v781_v51, %v780_v50 }
 0x167   : > { %1931 = vmatmul.msk.bf16.gmra.mxu2 %vm834_vm2, %v2497_v52 }
 0x168   : > { %v754_v53 = vpop.f32.mrf.mxu1 }
 0x169   : > { %v755_v54 = vadd.f32 %v2475_v25, %v754_v53 }
 0x16b   : > { %v782_v57 = vmax.f32 %v755_v54, 0.0 }
 0x170   : > { %v756_v55 = vpop.f32.mrf.mxu1 }
 0x171   : > { %v757_v56 = vadd.f32 %v2475_v25, %v756_v55 }
 0x173   : > { %v783_v58 = vmax.f32 %v757_v56, 0.0  ;;  %v2618_v56 = vld [vmem:[%s2964_s9] ss:$0 sm:$0xff] }
 0x175   : > { %v2503_v59 = vpack.c.bf16 %v783_v58, %v782_v57 }
 0x177   : > { %1932 = vmatmul.msk.bf16.gmra.mxu2 %vm834_vm2, %v2503_v59 }
 0x178   : > { %v759_v60 = vpop.f32.mrf.mxu1 }
 0x179   : > { %v760_v62 = vadd.f32 %v2475_v25, %v759_v60 }
 0x17b   : > { %v784_v2 = vmax.f32 %v760_v62, 0.0 }
 0x180   : > { %v761_v63 = vpop.f32.mrf.mxu1 }
 0x181   : > { %v762_v0 = vadd.f32 %v2475_v25, %v761_v63 }
 0x183   : > { %v785_v3 = vmax.f32 %v762_v0, 0.0 }
 0x185   : > { %v2515_v4 = vpack.c.bf16 %v785_v3, %v784_v2 }
 0x187   : > { %1933 = vmatmul.msk.bf16.gmra.mxu2 %vm834_vm2, %v2515_v4 }
 0x18e   : > { %v764_v6 = vpop.f32.mrf.mxu3 }
 0x18f   : > { %v765_v8 = vadd.f32 %v2475_v25, %v764_v6 }
 0x191   : > { %v786_v11 = vmax.f32 %v765_v8, 0.0 }
 0x196   : > { %v766_v9 = vpop.f32.mrf.mxu3 }
 0x197   : > { %v767_v10 = vadd.f32 %v2475_v25, %v766_v9 }
 0x199   : > { %v787_v12 = vmax.f32 %v767_v10, 0.0 }
 0x19b   : > { %v796_v13 = vpack.c.bf16 %v787_v12, %v786_v11 }
 0x19d   : > { %1934 = vmatmul.msk.bf16.vlgmr.msra.gmra.mxu3 %vm834_vm2, %v796_v13 }
 0x19e   : > { %v769_v14 = vpop.f32.mrf.mxu3 }
 0x19f   : > { %v770_v15 = vadd.f32 %v2475_v25, %v769_v14 }
 0x1a1   : > { %v788_v18 = vmax.f32 %v770_v15, 0.0 }
 0x1a6   : > { %v771_v16 = vpop.f32.mrf.mxu3 }
 0x1a7   : > { %v772_v17 = vadd.f32 %v2475_v25, %v771_v16 }
 0x1a9   : > { %v789_v19 = vmax.f32 %v772_v17, 0.0 }
 0x1ab   : > { %v797_v20 = vpack.c.bf16 %v789_v19, %v788_v18 }
 0x1ad   : > { %1935 = vmatmul.msk.bf16.gmra.mxu3 %vm834_vm2, %v797_v20 }
 0x1ba   : > { %v868_v22 = vpop.f32.mrf.mxu2 }
 0x1bb   : > { %v2534_v23 = vadd.f32 %v2084_v21, %v868_v22 }
 0x1bd   : > { %1952 = vmatmul.msk.bf16.vlgmr.msrb.gmra.mxu3 %vm834_vm2, %v2479_v31  ;;  %1590 = vrot.lane.b32.xlu1 %v2534_v23, %s2249_s29 }
 0x1c2   : > { %v870_v24 = vpop.f32.mrf.mxu2 }
 0x1c3   : > { %v2540_v25 = vadd.f32 %v2084_v21, %v870_v24 }
 0x1c5   : > { %1592 = vrot.lane.b32.xlu2 %v2540_v25, %s2249_s29 }
 0x1ca   : > { %v873_v26 = vpop.f32.mrf.mxu2 }
 0x1cb   : > { %v2544_v27 = vadd.f32 %v2084_v21, %v873_v26 }
 0x1cd   : > { %1953 = vmatmul.msk.bf16.gmra.mxu3 %vm834_vm2, %v2485_v38  ;;  %1594 = vrot.lane.b32.xlu0 %v2544_v27, %s2249_s29 }
 0x1d2   : > { %v875_v30 = vpop.f32.mrf.mxu2 }
 0x1d3   : > { %v2553_v31 = vadd.f32 %v2084_v21, %v875_v30 }
 0x1d5   : > { %1596 = vrot.lane.b32.xlu1 %v2553_v31, %s2249_s29 }
 0x1da   : > { %v878_v32 = vpop.f32.mrf.mxu2 }
 0x1db   : > { %v2557_v33 = vadd.f32 %v2084_v21, %v878_v32 }
 0x1dd   : > { %1954 = vmatmul.msk.bf16.gmra.mxu3 %vm834_vm2, %v2491_v45  ;;  %1598 = vrot.lane.b32.xlu2 %v2557_v33, %s2249_s29 }
 0x1e2   : > { %v880_v34 = vpop.f32.mrf.mxu2 }
 0x1e3   : > { %v2563_v35 = vadd.f32 %v2084_v21, %v880_v34 }
 0x1e5   : > { %1600 = vrot.lane.b32.xlu0 %v2563_v35, %s2249_s29 }
 0x1ea   : > { %v883_v36 = vpop.f32.mrf.mxu2 }
 0x1eb   : > { %v2567_v37 = vadd.f32 %v2084_v21, %v883_v36 }
 0x1ed   : > { %1955 = vmatmul.msk.bf16.gmra.mxu3 %vm834_vm2, %v2497_v52  ;;  %1602 = vrot.lane.b32.xlu1 %v2567_v37, %s2249_s29 }
 0x1f2   : > { %v885_v38 = vpop.f32.mrf.mxu2 }
 0x1f3   : > { %v2573_v39 = vadd.f32 %v2084_v21, %v885_v38 }
 0x1f5   : > { %1604 = vrot.lane.b32.xlu2 %v2573_v39, %s2249_s29 }
 0x1fa   : > { %v888_v40 = vpop.f32.mrf.mxu2 }
 0x1fb   : > { %v2577_v41 = vadd.f32 %v2084_v21, %v888_v40 }
 0x1fd   : > { %1956 = vmatmul.msk.bf16.gmra.mxu3 %vm834_vm2, %v2503_v59  ;;  %1606 = vrot.lane.b32.xlu0 %v2577_v41, %s2249_s29 }
 0x202   : > { %v890_v42 = vpop.f32.mrf.mxu2 }
 0x203   : > { %v2583_v43 = vadd.f32 %v2084_v21, %v890_v42 }
 0x205   : > { %1608 = vrot.lane.b32.xlu1 %v2583_v43, %s2249_s29 }
 0x20a   : > { %v893_v44 = vpop.f32.mrf.mxu2 }
 0x20b   : > { %v2587_v45 = vadd.f32 %v2084_v21, %v893_v44 }
 0x20d   : > { %1957 = vmatmul.msk.bf16.gmra.mxu3 %vm834_vm2, %v2515_v4  ;;  %1610 = vrot.lane.b32.xlu2 %v2587_v45, %s2249_s29 }
 0x212   : > { %v895_v46 = vpop.f32.mrf.mxu2 }
 0x213   : > { %v2593_v47 = vadd.f32 %v2084_v21, %v895_v46  ;;  %v2027_v46 = vld [vmem:[%s2967_s12 + $0x18] sm:$0xff] }
 0x214   : > { %1268 = vmatpush.bf16.msrb.mxu1 %v2027_v46 }
 0x215   : > { %1612 = vrot.lane.b32.xlu0 %v2593_v47, %s2249_s29 }
 0x21d   : > { %1958 = vmatmul.msk.bf16.gmra.mxu3 %vm834_vm2, %v796_v13 }
 0x220   : > { %v898_v48 = vpop.f32.mrf.mxu3 }
 0x221   : > { %v2598_v49 = vadd.f32 %v2084_v21, %v898_v48 }
 0x223   : > { %1614 = vrot.lane.b32.xlu1 %v2598_v49, %s2249_s29 }
 0x228   : > { %v900_v50 = vpop.f32.mrf.mxu3 }
 0x229   : > { %v2602_v51 = vadd.f32 %v2084_v21, %v900_v50 }
 0x22b   : > { %1616 = vrot.lane.b32.xlu2 %v2602_v51, %s2249_s29 }
 0x22d   : > { %1959 = vmatmul.msk.bf16.gmra.mxu3 %vm834_vm2, %v797_v20 }
 0x230   : > { %v903_v52 = vpop.f32.mrf.mxu3 }
 0x231   : > { %v2607_v53 = vadd.f32 %v2084_v21, %v903_v52 }
 0x233   : > { %1618 = vrot.lane.b32.xlu0 %v2607_v53, %s2249_s29 }
 0x238   : > { %v905_v54 = vpop.f32.mrf.mxu3 }
 0x239   : > { %v2611_v55 = vadd.f32 %v2084_v21, %v905_v54 }
 0x23b   : > { %1620 = vrot.lane.b32.xlu1 %v2611_v55, %s2249_s29  ;;  %s2627_s29 = scalar_lea.vmem %s2986_s1, %s2985_s28  ;;  %s2205_s1 = scalar_lea.hbm %s2971_s16, 256 }
 0x23c   : > { %v1041_v0 = vld [vmem:[%s2627_s29] sm:$0xff]  ;;  %v1042_v8 = vld [vmem:[%s2627_s29 + $0x8] sm:$0xff]  ;;  %v1043_v17 = vld [vmem:[%s2627_s29 + $0x10] sm:$0xff] }
 0x23d   : > { %v1045_v38 = vld [vmem:[%s2627_s29 + $0x20] sm:$0xff]  ;;  %v1046_v54 = vld [vmem:[%s2627_s29 + $0x28] sm:$0xff] }
 0x240   : > { %v953_v57 = vpop.f32.mrf.mxu3 }
 0x241   : > { %v954_v58 = vadd.f32 %v2618_v56, %v953_v57 }
 0x243   : > { %v993_v59 = vmul.f32 0.5, %v954_v58  ;;  %1654 = vrot.lane.b32.xlu2 %v954_v58, %s2250_s19 }
 0x245   : > { %v1009_v60 = vmul.f32 1.442695, %v993_v59 }
 0x247   : > { %2089 = vpow2.f32 %v1009_v60 }
 0x248   : > { %v955_v61 = vpop.f32.mrf.mxu3 }
 0x249   : > { %v956_v62 = vadd.f32 %v2618_v56, %v955_v61 }
 0x24b   : > { %v994_v63 = vmul.f32 0.5, %v956_v62  ;;  %1656 = vrot.lane.b32.xlu0 %v956_v62, %s2250_s19 }
 0x24d   : > { %v2090_v1 = vpop.eup %2089  ;;  %v1011_v2 = vmul.f32 1.442695, %v994_v63 }
 0x24e   : > { %v1057_v3 = vmul.f32 %v2090_v1, %v1041_v0  ;;  %v1047_v0 = vld [vmem:[%s2627_s29 + $0x30] sm:$0xff] }
 0x24f   : > { %2091 = vpow2.f32 %v1011_v2 }
 0x250   : > { %v958_v4 = vpop.f32.mrf.mxu3  ;;  %v1073_v5 = vadd.f32 %v1057_v3, %v2534_v23 }
 0x251   : > { %v959_v6 = vadd.f32 %v2618_v56, %v958_v4 }
 0x253   : > { %v995_v7 = vmul.f32 0.5, %v959_v6  ;;  %1658 = vrot.lane.b32.xlu1 %v959_v6, %s2250_s19  ;;  %1526 = vrot.lane.b32.xlu0 %v1073_v5, %s2251_s20 }
 0x255   : > { %v2092_v9 = vpop.eup %2091  ;;  %v1013_v10 = vmul.f32 1.442695, %v995_v7  ;;  %v1048_v7 = vld [vmem:[%s2627_s29 + $0x38] sm:$0xff] }
 0x256   : > { %v1058_v11 = vmul.f32 %v2092_v9, %v1042_v8 }
 0x257   : > { %2093 = vpow2.f32 %v1013_v10 }
 0x258   : > { %v960_v12 = vpop.f32.mrf.mxu3  ;;  %v1074_v13 = vadd.f32 %v1058_v11, %v2540_v25  ;;  %v1044_v25 = vld [vmem:[%s2627_s29 + $0x18] sm:$0xff]  ;;  %v2026_v11 = vld [vmem:[%s2967_s12 + $0x10] sm:$0xff] }
 0x259   : > { %v961_v14 = vadd.f32 %v2618_v56, %v960_v12  ;;  %1269 = vmatpush.bf16.msrb.mxu1 %v2026_v11 }
 0x25a   : > { %v1089_v15 = vpack.c.bf16 %v1074_v13, %v1073_v5 }
 0x25b   : > { %v996_v16 = vmul.f32 0.5, %v961_v14  ;;  %1660 = vrot.lane.b32.xlu2 %v961_v14, %s2250_s19  ;;  %1528 = vrot.lane.b32.xlu0 %v1074_v13, %s2251_s20 }
 0x25c   : > { %1960 = vmatmul.msk.bf16.vlgmr.msrb.gmra.mxu0 %vm1102_vm4, %v1089_v15 }
 0x25d   : > { %v2094_v18 = vpop.eup %2093  ;;  %v1015_v19 = vmul.f32 1.442695, %v996_v16  ;;  %v1049_v16 = vld [vmem:[%s2627_s29 + $0x40] sm:$0xff] }
 0x25e   : > { %v1059_v20 = vmul.f32 %v2094_v18, %v1043_v17 }
 0x25f   : > { %2095 = vpow2.f32 %v1015_v19 }
 0x260   : > { %v963_v21 = vpop.f32.mrf.mxu3  ;;  %v1075_v22 = vadd.f32 %v1059_v20, %v2544_v27 }
 0x261   : > { %v964_v23 = vadd.f32 %v2618_v56, %v963_v21 }
 0x262   : > { %1530 = vrot.lane.b32.xlu1 %v1075_v22, %s2251_s20 }
 0x263   : > { %v997_v24 = vmul.f32 0.5, %v964_v23  ;;  %1662 = vrot.lane.b32.xlu0 %v964_v23, %s2250_s19  ;;  %v1050_v23 = vld [vmem:[%s2627_s29 + $0x48] sm:$0xff] }
 0x265   : > { %v2096_v26 = vpop.eup %2095  ;;  %v1017_v28 = vmul.f32 1.442695, %v997_v24 }
 0x266   : > { %v1060_v29 = vmul.f32 %v2096_v26, %v1044_v25 }
 0x267   : > { %2097 = vpow2.f32 %v1017_v28 }
 0x268   : > { %v965_v30 = vpop.f32.mrf.mxu3  ;;  %v1076_v32 = vadd.f32 %v1060_v29, %v2553_v31 }
 0x269   : > { %v966_v34 = vadd.f32 %v2618_v56, %v965_v30 }
 0x26a   : > { %1532 = vrot.lane.b32.xlu1 %v1076_v32, %s2251_s20  ;;  %v1090_v27 = vpack.c.bf16 %v1076_v32, %v1075_v22 }
 0x26b   : > { %v998_v36 = vmul.f32 0.5, %v966_v34 }
 0x26c   : > { %1961 = vmatmul.msk.bf16.gmra.mxu0 %vm1102_vm4, %v1090_v27 }
 0x26d   : > { %v2098_v40 = vpop.eup %2097  ;;  %v1019_v42 = vmul.f32 1.442695, %v998_v36 }
 0x26e   : > { %v1061_v44 = vmul.f32 %v2098_v40, %v1045_v38 }
 0x26f   : > { %2099 = vpow2.f32 %v1019_v42 }
 0x270   : > { %v968_v48 = vpop.f32.mrf.mxu3  ;;  %v1077_v31 = vadd.f32 %v1061_v44, %v2557_v33 }
 0x271   : > { %v969_v50 = vadd.f32 %v2618_v56, %v968_v48  ;;  %v1052_v48 = vld [vmem:[%s2627_s29 + $0x58] sm:$0xff] }
 0x272   : > { %1534 = vrot.lane.b32.xlu2 %v1077_v31, %s2251_s20  ;;  %1664 = vrot.lane.b32.xlu1 %v966_v34, %s2250_s19  ;;  %v1051_v34 = vld [vmem:[%s2627_s29 + $0x50] sm:$0xff] }
 0x273   : > { %v999_v52 = vmul.f32 0.5, %v969_v50 }
 0x275   : > { %v2100_v57 = vpop.eup %2099  ;;  %v1021_v58 = vmul.f32 1.442695, %v999_v52 }
 0x276   : > { %v1062_v59 = vmul.f32 %v2100_v57, %v1046_v54 }
 0x277   : > { %2101 = vpow2.f32 %v1021_v58 }
 0x278   : > { %v970_v60 = vpop.f32.mrf.mxu3  ;;  %v1078_v61 = vadd.f32 %v1062_v59, %v2563_v35 }
 0x279   : > { %v971_v62 = vadd.f32 %v2618_v56, %v970_v60  ;;  %v1053_v60 = vld [vmem:[%s2627_s29 + $0x60] sm:$0xff] }
 0x27a   : > { %1666 = vrot.lane.b32.xlu2 %v969_v50, %s2250_s19  ;;  %v1091_v33 = vpack.c.bf16 %v1078_v61, %v1077_v31 }
 0x27b   : > { %v1000_v63 = vmul.f32 0.5, %v971_v62  ;;  %1668 = vrot.lane.b32.xlu0 %v971_v62, %s2250_s19 }
 0x27c   : > { %1962 = vmatmul.msk.bf16.gmra.mxu0 %vm1102_vm4, %v1091_v33  ;;  %v2024_v33 = vld [vmem:[%s2967_s12] sm:$0xff] }
 0x27d   : > { %v2102_v1 = vpop.eup %2101  ;;  %v1023_v2 = vmul.f32 1.442695, %v1000_v63 }
 0x27e   : > { %v1063_v3 = vmul.f32 %v2102_v1, %v1047_v0 }
 0x27f   : > { %2103 = vpow2.f32 %v1023_v2 }
 0x280   : > { %v973_v4 = vpop.f32.mrf.mxu3  ;;  %v1079_v5 = vadd.f32 %v1063_v3, %v2567_v37  ;;  %v1054_v3 = vld [vmem:[%s2627_s29 + $0x68] sm:$0xff] }
 0x281   : > { %v974_v35 = vadd.f32 %v2618_v56, %v973_v4 }
 0x282   : > { %1536 = vrot.lane.b32.xlu2 %v1078_v61, %s2251_s20 }
 0x283   : > { %v1001_v6 = vmul.f32 0.5, %v974_v35  ;;  %1670 = vrot.lane.b32.xlu1 %v974_v35, %s2250_s19  ;;  %1538 = vrot.lane.b32.xlu0 %v1079_v5, %s2251_s20 }
 0x285   : > { %v2104_v8 = vpop.eup %2103  ;;  %v1025_v9 = vmul.f32 1.442695, %v1001_v6 }
 0x286   : > { %v1064_v10 = vmul.f32 %v2104_v8, %v1048_v7 }
 0x287   : > { %2105 = vpow2.f32 %v1025_v9 }
 0x288   : > { %v975_v37 = vpop.f32.mrf.mxu3  ;;  %v1080_v12 = vadd.f32 %v1064_v10, %v2573_v39  ;;  %v1055_v10 = vld [vmem:[%s2627_s29 + $0x70] sm:$0xff] }
 0x289   : > { %v976_v13 = vadd.f32 %v2618_v56, %v975_v37 }
 0x28a   : > { %v1092_v14 = vpack.c.bf16 %v1080_v12, %v1079_v5 }
 0x28b   : > { %v1002_v15 = vmul.f32 0.5, %v976_v13  ;;  %1672 = vrot.lane.b32.xlu2 %v976_v13, %s2250_s19  ;;  %1540 = vrot.lane.b32.xlu1 %v1080_v12, %s2251_s20 }
 0x28c   : > { %1963 = vmatmul.msk.bf16.gmra.mxu0 %vm1102_vm4, %v1092_v14 }
 0x28d   : > { %v2106_v17 = vpop.eup %2105  ;;  %v1027_v18 = vmul.f32 1.442695, %v1002_v15 }
 0x28e   : > { %v1065_v19 = vmul.f32 %v2106_v17, %v1049_v16 }
 0x28f   : > { %2107 = vpow2.f32 %v1027_v18 }
 0x290   : > { %v978_v20 = vpop.f32.mrf.mxu3  ;;  %v1081_v39 = vadd.f32 %v1065_v19, %v2577_v41 }
 0x291   : > { %v979_v21 = vadd.f32 %v2618_v56, %v978_v20 }
 0x293   : > { %v1003_v22 = vmul.f32 0.5, %v979_v21  ;;  %1542 = vrot.lane.b32.xlu2 %v1081_v39, %s2251_s20  ;;  %1674 = vrot.lane.b32.xlu0 %v979_v21, %s2250_s19 }
 0x295   : > { %v2108_v24 = vpop.eup %2107  ;;  %v1029_v25 = vmul.f32 1.442695, %v1003_v22 }
 0x296   : > { %v1066_v26 = vmul.f32 %v2108_v24, %v1050_v23 }
 0x297   : > { %2109 = vpow2.f32 %v1029_v25 }
 0x298   : > { %v980_v28 = vpop.f32.mrf.mxu3  ;;  %v1082_v29 = vadd.f32 %v1066_v26, %v2583_v43  ;;  %v2025_v43 = vld [vmem:[%s2967_s12 + $0x8] sm:$0xff] }
 0x299   : > { %v981_v30 = vadd.f32 %v2618_v56, %v980_v28  ;;  %1270 = vmatpush.bf16.msrb.mxu1 %v2025_v43 }
 0x29a   : > { %v1093_v32 = vpack.c.bf16 %v1082_v29, %v1081_v39 }
 0x29b   : > { %v1004_v41 = vmul.f32 0.5, %v981_v30  ;;  %1676 = vrot.lane.b32.xlu1 %v981_v30, %s2250_s19  ;;  %1544 = vrot.lane.b32.xlu0 %v1082_v29, %s2251_s20  ;;  %v2029_v30 = vld [vmem:[%s2969_s14 + $0x8] sm:$0xff] }
 0x29c   : > { %1964 = vmatmul.msk.bf16.gmra.mxu0 %vm1102_vm4, %v1093_v32  ;;  %1387 = vmatpush.bf16.msrb.mxu2 %v2029_v30 }
 0x29d   : > { %v2110_v27 = vpop.eup %2109  ;;  %v1031_v36 = vmul.f32 1.442695, %v1004_v41  ;;  %1271 = vmatpush.bf16.msrb.mxu1 %v2024_v33 }
 0x29e   : > { %v1067_v38 = vmul.f32 %v2110_v27, %v1051_v34 }
 0x29f   : > { %2111 = vpow2.f32 %v1031_v36 }
 0x2a0   : > { %v983_v40 = vpop.f32.mrf.mxu3  ;;  %v1083_v42 = vadd.f32 %v1067_v38, %v2587_v45 }
 0x2a1   : > { %v984_v44 = vadd.f32 %v2618_v56, %v983_v40 }
 0x2a3   : > { %v1005_v46 = vmul.f32 0.5, %v984_v44  ;;  %1678 = vrot.lane.b32.xlu2 %v984_v44, %s2250_s19  ;;  %1546 = vrot.lane.b32.xlu1 %v1083_v42, %s2251_s20 }
 0x2a5   : > { %v2112_v31 = vpop.eup %2111  ;;  %v1033_v50 = vmul.f32 1.442695, %v1005_v46 }
 0x2a6   : > { %v1068_v52 = vmul.f32 %v2112_v31, %v1052_v48 }
 0x2a7   : > { %2113 = vpow2.f32 %v1033_v50 }
 0x2a8   : > { %v985_v54 = vpop.f32.mrf.mxu3  ;;  %v1084_v57 = vadd.f32 %v1068_v52, %v2593_v47 }
 0x2a9   : > { %v986_v58 = vadd.f32 %v2618_v56, %v985_v54 }
 0x2aa   : > { %v1094_v45 = vpack.c.bf16 %v1084_v57, %v1083_v42 }
 0x2ab   : > { %v1006_v59 = vmul.f32 0.5, %v986_v58  ;;  %1548 = vrot.lane.b32.xlu2 %v1084_v57, %s2251_s20 }
 0x2ac   : > { %1965 = vmatmul.msk.bf16.gmra.mxu0 %vm1102_vm4, %v1094_v45 }
 0x2ad   : > { %v2114_v61 = vpop.eup %2113  ;;  %v1035_v62 = vmul.f32 1.442695, %v1006_v59 }
 0x2ae   : > { %v1069_v63 = vmul.f32 %v2114_v61, %v1053_v60  ;;  %v2028_v61 = vld [vmem:[%s2969_s14] sm:$0xff] }
 0x2af   : > { %2115 = vpow2.f32 %v1035_v62  ;;  %1388 = vmatpush.bf16.msrb.mxu2 %v2028_v61 }
 0x2b0   : > { %v988_v47 = vpop.f32.mrf.mxu3  ;;  %v1085_v0 = vadd.f32 %v1069_v63, %v2598_v49 }
 0x2b1   : > { %v989_v1 = vadd.f32 %v2618_v56, %v988_v47 }
 0x2b2   : > { %1550 = vrot.lane.b32.xlu0 %v1085_v0, %s2251_s20 }
 0x2b3   : > { %v1007_v2 = vmul.f32 0.5, %v989_v1 }
 0x2b5   : > { %v2116_v4 = vpop.eup %2115  ;;  %v1037_v5 = vmul.f32 1.442695, %v1007_v2 }
 0x2b6   : > { %v1070_v35 = vmul.f32 %v2116_v4, %v1054_v3 }
 0x2b7   : > { %2117 = vpow2.f32 %v1037_v5 }
 0x2b8   : > { %v990_v6 = vpop.f32.mrf.mxu3  ;;  %v1086_v7 = vadd.f32 %v1070_v35, %v2602_v51  ;;  %v1056_v51 = vld [vmem:[%s2627_s29 + $0x78] sm:$0xff] }
 0x2b9   : > { %v991_v8 = vadd.f32 %v2618_v56, %v990_v6 }
 0x2ba   : > { %v1095_v9 = vpack.c.bf16 %v1086_v7, %v1085_v0  ;;  %1552 = vrot.lane.b32.xlu1 %v1086_v7, %s2251_s20 }
 0x2bb   : > { %v1008_v49 = vmul.f32 0.5, %v991_v8 }
 0x2bc   : > { %1966 = vmatmul.msk.bf16.gmra.mxu0 %vm1102_vm4, %v1095_v9 }
 0x2bd   : > { %v2118_v11 = vpop.eup %2117  ;;  %v1039_v37 = vmul.f32 1.442695, %v1008_v49 }
 0x2be   : > { %v1071_v12 = vmul.f32 %v2118_v11, %v1055_v10 }
 0x2bf   : > { %2119 = vpow2.f32 %v1039_v37 }
 0x2c0   : > { %v1087_v13 = vadd.f32 %v1071_v12, %v2607_v53  ;;  %v2730_v53 = vld [vmem:[%s2966_s11] ss:$0 sm:$0xff] }
 0x2c2   : > { %1554 = vrot.lane.b32.xlu2 %v1087_v13, %s2251_s20  ;;  %1682 = vrot.lane.b32.xlu1 %v989_v1, %s2250_s19 }
 0x2c5   : > { %v2120_v14 = vpop.eup %2119 }
 0x2c6   : > { %v1072_v56 = vmul.f32 %v2120_v14, %v1056_v51  ;;  %v2087_v14 = vld [vmem:[%s2968_s13] ss:$0 sm:$0xff] }
 0x2c8   : > { %v1088_v15 = vadd.f32 %v1072_v56, %v2611_v55 }
 0x2ca   : > { %1684 = vrot.lane.b32.xlu2 %v991_v8, %s2250_s19  ;;  %v1096_v16 = vpack.c.bf16 %v1088_v15, %v1087_v13  ;;  %1556 = vrot.lane.b32.xlu0 %v1088_v15, %s2251_s20 }
 0x2cc   : > { %1967 = vmatmul.msk.bf16.gmra.mxu0 %vm1102_vm4, %v1096_v16 }
 0x2d2   : > { %1680 = vrot.lane.b32.xlu0 %v986_v58, %s2250_s19  ;;  %s529_s19 = sand.u32 1, %s2239_s22  }
 0x2d3   : > { %s1879_s29 = sshll.u32 %s529_s19, 7  ;;  %s1786_s25 = scalar_lea.sflag [#allocation3], %s529_s19 }
 0x2d4   : > { %s2817_s20 = scalar_lea.vmem [#allocation2], %s1879_s29  ;;  %s1800_s29 = sshll.u32 %s1797_s23, 4  ;;  %s1801_s29 = int_to_ptr.hbm [resolvable:$true] %s1800_s29 }
 0x2d5   : > { %s1798_s26 = sshll.u32 %s2817_s20, 4  ;;  %s2199_s30 = sshra.s32 %s1801_s29, 4  ;;  %s1799_s26 = int_to_ptr.vmem [resolvable:$true] %s1798_s26  ;;  %s2200_s30 = int_to_ptr.hbm [resolvable:$true] %s2199_s30 }
 0x2d6   : > { %s2201_s18 = scalar_lea.hbm %s2200_s30, 128  ;;  %p2206_p0 = scmp.lt.s32.totalorder %s2200_s30, %s2971_s16 }
 0x2d7   : > { %p2202_p11 = scmp.ne.s32.totalorder %s2200_s30, %s2201_s18  ;;  %p2207_p1 = scmp.lt.s32.totalorder %s2205_s1, %s2201_s18 }
 0x2d9   : > { %v1140_v17 = vpop.f32.mrf.mxu0  ;;  %p2203_p12 = pnand %p2202_p11, %p2377_p5  ;;  %p2208_p2 = por %p2207_p1, %p2206_p0 }
 0x2da   : > { %v1141_v18 = vadd.f32 %v2730_v53, %v1140_v17 }
 0x2db   : > { %p2204_p13 = pneg %p2203_p12 }
 0x2dc   : > { %v1180_v20 = vmax.f32 %v1141_v18, 0.0 }
 0x2dd   : > { %p2209_p3 = pnand %p2208_p2, %p2204_p13 }
 0x2e1   : > { %v1142_v19 = vpop.f32.mrf.mxu0 }
 0x2e2   : > { %v1143_v55 = vadd.f32 %v2730_v53, %v1142_v19 }
 0x2e4   : > { %v1181_v39 = vmax.f32 %v1143_v55, 0.0 }
 0x2e6   : > { %v1196_v21 = vpack.c.bf16 %v1181_v39, %v1180_v20 }
 0x2e8   : > { %1984 = vmatmul.msk.bf16.vlgmr.msrb.gmra.mxu1 %vm834_vm2, %v1196_v21 }
 0x2e9   : > { %v1145_v22 = vpop.f32.mrf.mxu0 }
 0x2ea   : > { %v1146_v23 = vadd.f32 %v2730_v53, %v1145_v22 }
 0x2ec   : > { %v1182_v26 = vmax.f32 %v1146_v23, 0.0 }
 0x2f1   : > { %v1147_v24 = vpop.f32.mrf.mxu0 }
 0x2f2   : > { %v1148_v25 = vadd.f32 %v2730_v53, %v1147_v24 }
 0x2f4   : > { %v1183_v28 = vmax.f32 %v1148_v25, 0.0 }
 0x2f6   : > { %v1197_v29 = vpack.c.bf16 %v1183_v28, %v1182_v26 }
 0x2f8   : > { %1985 = vmatmul.msk.bf16.gmra.mxu1 %vm834_vm2, %v1197_v29 }
 0x2f9   : > { %v1150_v32 = vpop.f32.mrf.mxu0 }
 0x2fa   : > { %v1151_v41 = vadd.f32 %v2730_v53, %v1150_v32 }
 0x2fc   : > { %v1184_v36 = vmax.f32 %v1151_v41, 0.0 }
 0x301   : > { %v1152_v34 = vpop.f32.mrf.mxu0 }
 0x302   : > { %v1153_v27 = vadd.f32 %v2730_v53, %v1152_v34 }
 0x304   : > { %v1185_v38 = vmax.f32 %v1153_v27, 0.0 }
 0x306   : > { %v1198_v43 = vpack.c.bf16 %v1185_v38, %v1184_v36 }
 0x308   : > { %1986 = vmatmul.msk.bf16.gmra.mxu1 %vm834_vm2, %v1198_v43 }
 0x309   : > { %v1155_v40 = vpop.f32.mrf.mxu0 }
 0x30a   : > { %v1156_v42 = vadd.f32 %v2730_v53, %v1155_v40 }
 0x30c   : > { %v1186_v48 = vmax.f32 %v1156_v42, 0.0 }
 0x311   : > { %v1157_v44 = vpop.f32.mrf.mxu0 }
 0x312   : > { %v1158_v46 = vadd.f32 %v2730_v53, %v1157_v44 }
 0x314   : > { %v1187_v31 = vmax.f32 %v1158_v46, 0.0 }
 0x316   : > { %v1199_v50 = vpack.c.bf16 %v1187_v31, %v1186_v48 }
 0x318   : > { %1987 = vmatmul.msk.bf16.gmra.mxu1 %vm834_vm2, %v1199_v50 }
 0x319   : > { %v1160_v52 = vpop.f32.mrf.mxu0 }
 0x31a   : > { %v1161_v54 = vadd.f32 %v2730_v53, %v1160_v52 }
 0x31c   : > { %v1188_v45 = vmax.f32 %v1161_v54, 0.0 }
 0x321   : > { %v1162_v57 = vpop.f32.mrf.mxu0 }
 0x322   : > { %v1163_v58 = vadd.f32 %v2730_v53, %v1162_v57 }
 0x324   : > { %v1189_v59 = vmax.f32 %v1163_v58, 0.0 }
 0x326   : > { %v1200_v60 = vpack.c.bf16 %v1189_v59, %v1188_v45 }
 0x328   : > { %1988 = vmatmul.msk.bf16.gmra.mxu1 %vm834_vm2, %v1200_v60 }
 0x329   : > { %v1165_v62 = vpop.f32.mrf.mxu0 }
 0x32a   : > { %v1166_v33 = vadd.f32 %v2730_v53, %v1165_v62 }
 0x32c   : > { %v1190_v0 = vmax.f32 %v1166_v33, 0.0 }
 0x331   : > { %v1167_v63 = vpop.f32.mrf.mxu0 }
 0x332   : > { %v1168_v47 = vadd.f32 %v2730_v53, %v1167_v63 }
 0x334   : > { %v1191_v1 = vmax.f32 %v1168_v47, 0.0 }
 0x336   : > { %v1201_v2 = vpack.c.bf16 %v1191_v1, %v1190_v0 }
 0x338   : > { %1989 = vmatmul.msk.bf16.gmra.mxu1 %vm834_vm2, %v1201_v2 }
 0x339   : > { %v1170_v3 = vpop.f32.mrf.mxu0 }
 0x33a   : > { %v1171_v4 = vadd.f32 %v2730_v53, %v1170_v3 }
 0x33c   : > { %v1192_v6 = vmax.f32 %v1171_v4, 0.0  ;;  %v2772_v4 = vpop.permute.xlu0 %1594 }
 0x341   : > { %v1172_v5 = vpop.f32.mrf.mxu0 }
 0x342   : > { %v1173_v35 = vadd.f32 %v2730_v53, %v1172_v5 }
 0x344   : > { %v1193_v7 = vmax.f32 %v1173_v35, 0.0 }
 0x346   : > { %v1202_v8 = vpack.c.bf16 %v1193_v7, %v1192_v6 }
 0x348   : > { %1990 = vmatmul.msk.bf16.gmra.mxu1 %vm834_vm2, %v1202_v8 }
 0x349   : > { %v1175_v9 = vpop.f32.mrf.mxu0 }
 0x34a   : > { %v1176_v49 = vadd.f32 %v2730_v53, %v1175_v9  ;;  %v2774_v9 = vpop.permute.xlu0 %1600 }
 0x34c   : > { %v1194_v37 = vmax.f32 %v1176_v49, 0.0 }
 0x351   : > { %v1177_v10 = vpop.f32.mrf.mxu0 }
 0x352   : > { %v1178_v11 = vadd.f32 %v2730_v53, %v1177_v10  ;;  %v1591_v10 = vpop.permute.xlu1 %1590 }
 0x354   : > { %v1195_v12 = vmax.f32 %v1178_v11, 0.0  ;;  %v1593_v11 = vpop.permute.xlu2 %1592 }
 0x356   : > { %v1203_v13 = vpack.c.bf16 %v1195_v12, %v1194_v37  ;;  %v2777_v37 = vpop.permute.xlu0 %1606 }
 0x358   : > { %1991 = vmatmul.msk.bf16.gmra.mxu1 %vm834_vm2, %v1203_v13 }
 0x35a   : > { %v2779_v12 = vpop.permute.xlu1 %1596 }
 0x35c   : > { %v2781_v13 = vpop.permute.xlu2 %1598 }
 0x365   : > { %v1273_v51 = vpop.f32.mrf.mxu1 }
 0x366   : > { %v1274_v56 = vadd.f32 %v2087_v14, %v1273_v51  ;;  %v2783_v51 = vpop.permute.xlu0 %1612 }
 0x368   : > { %v1313_v17 = vmax.f32 %v1274_v56, 0.0  ;;  %v2785_v56 = vpop.permute.xlu1 %1602 }
 0x36d   : > { %v1275_v15 = vpop.f32.mrf.mxu1 }
 0x36e   : > { %v1276_v16 = vadd.f32 %v2087_v14, %v1275_v15  ;;  %v2792_v15 = vpop.permute.xlu2 %1604 }
 0x370   : > { %v1314_v18 = vmax.f32 %v1276_v16, 0.0 }
 0x372   : > { %v1329_v19 = vpack.c.bf16 %v1314_v18, %v1313_v17  ;;  %v2795_v18 = vpop.permute.xlu0 %1618 }
 0x374   : > { %2000 = vmatmul.msk.bf16.vlgmr.msrb.gmra.mxu2 %vm700_vm1, %v1329_v19 }
 0x375   : > { %v1278_v55 = vpop.f32.mrf.mxu1 }
 0x376   : > { %v1279_v53 = vadd.f32 %v2087_v14, %v1278_v55  ;;  %v2797_v55 = vpop.permute.xlu1 %1608 }
 0x378   : > { %v1315_v21 = vmax.f32 %v1279_v53, 0.0 }
 0x37d   : > { %v1280_v20 = vpop.f32.mrf.mxu1 }
 0x37e   : > { %v1281_v39 = vadd.f32 %v2087_v14, %v1280_v20  ;;  %v2799_v20 = vpop.permute.xlu2 %1610 }
 0x380   : > { %v1316_v22 = vmax.f32 %v1281_v39, 0.0 }
 0x382   : > { %v1330_v23 = vpack.c.bf16 %v1316_v22, %v1315_v21  ;;  %v1657_v22 = vpop.permute.xlu0 %1656 }
 0x384   : > { %2001 = vmatmul.msk.bf16.gmra.mxu2 %vm700_vm1, %v1330_v23 }
 0x385   : > { %v1283_v24 = vpop.f32.mrf.mxu1 }
 0x386   : > { %v1284_v25 = vadd.f32 %v2087_v14, %v1283_v24  ;;  %v2802_v24 = vpop.permute.xlu1 %1614 }
 0x388   : > { %v1317_v29 = vmax.f32 %v1284_v25, 0.0 }
 0x38d   : > { %v1285_v26 = vpop.f32.mrf.mxu1 }
 0x38e   : > { %v1286_v28 = vadd.f32 %v2087_v14, %v1285_v26 }
 0x390   : > { %v1318_v30 = vmax.f32 %v1286_v28, 0.0 }
 0x392   : > { %v1331_v32 = vpack.c.bf16 %v1318_v30, %v1317_v29  ;;  %v2804_v29 = vpop.permute.xlu2 %1616 }
 0x394   : > { %2002 = vmatmul.msk.bf16.gmra.mxu2 %vm700_vm1, %v1331_v32 }
 0x395   : > { %v1288_v41 = vpop.f32.mrf.mxu1 }
 0x396   : > { %v1289_v34 = vadd.f32 %v2087_v14, %v1288_v41 }
 0x398   : > { %v1319_v38 = vmax.f32 %v1289_v34, 0.0  ;;  %v2808_v34 = vpop.permute.xlu1 %1620 }
 0x39d   : > { %v1290_v27 = vpop.f32.mrf.mxu1 }
 0x39e   : > { %v1291_v36 = vadd.f32 %v2087_v14, %v1290_v27  ;;  %v1527_v27 = vpop.permute.xlu0 %1526 }
 0x3a0   : > { %v1320_v43 = vmax.f32 %v1291_v36, 0.0 }
 0x3a2   : > { %v1332_v40 = vpack.c.bf16 %v1320_v43, %v1319_v38 }
 0x3a4   : > { %2003 = vmatmul.msk.bf16.gmra.mxu2 %vm700_vm1, %v1332_v40 }
 0x3a5   : > { %v1293_v42 = vpop.f32.mrf.mxu1 }
 0x3a6   : > { %v1294_v44 = vadd.f32 %v2087_v14, %v1293_v42 }
 0x3a8   : > { %v1321_v31 = vmax.f32 %v1294_v44, 0.0  ;;  %v1655_v44 = vpop.permute.xlu2 %1654 }
 0x3ad   : > { %v1295_v46 = vpop.f32.mrf.mxu1 }
 0x3ae   : > { %v1296_v48 = vadd.f32 %v2087_v14, %v1295_v46 }
 0x3b0   : > { %v1322_v50 = vmax.f32 %v1296_v48, 0.0 }
 0x3b2   : > { %v1333_v52 = vpack.c.bf16 %v1322_v50, %v1321_v31 }
 0x3b4   : > { %2004 = vmatmul.msk.bf16.gmra.mxu2 %vm700_vm1, %v1333_v52 }
 0x3b5   : > { %v1298_v54 = vpop.f32.mrf.mxu1 }
 0x3b6   : > { %v1299_v57 = vadd.f32 %v2087_v14, %v1298_v54 }
 0x3b8   : > { %v1323_v59 = vmax.f32 %v1299_v57, 0.0  ;;  %v1659_v57 = vpop.permute.xlu1 %1658 }
 0x3bd   : > { %v1300_v58 = vpop.f32.mrf.mxu1 }
 0x3be   : > { %v1301_v45 = vadd.f32 %v2087_v14, %v1300_v58 }
 0x3c0   : > { %v1324_v60 = vmax.f32 %v1301_v45, 0.0 }
 0x3c2   : > { %v1334_v61 = vpack.c.bf16 %v1324_v60, %v1323_v59  ;;  %v1529_v60 = vpop.permute.xlu0 %1528 }
 0x3c4   : > { %2005 = vmatmul.msk.bf16.gmra.mxu2 %vm700_vm1, %v1334_v61 }
 0x3c5   : > { %v1303_v62 = vpop.f32.mrf.mxu1 }
 0x3c6   : > { %v1304_v33 = vadd.f32 %v2087_v14, %v1303_v62 }
 0x3c8   : > { %v1325_v0 = vmax.f32 %v1304_v33, 0.0 }
 0x3cd   : > { %v1305_v63 = vpop.f32.mrf.mxu1 }
 0x3ce   : > { %v1306_v47 = vadd.f32 %v2087_v14, %v1305_v63 }
 0x3d0   : > { %v1326_v1 = vmax.f32 %v1306_v47, 0.0 }
 0x3d2   : > { %v1335_v2 = vpack.c.bf16 %v1326_v1, %v1325_v0  ;;  %v1661_v1 = vpop.permute.xlu2 %1660 }
 0x3d4   : > { %2006 = vmatmul.msk.bf16.gmra.mxu2 %vm700_vm1, %v1335_v2 }
 0x3d5   : > { %v1308_v3 = vpop.f32.mrf.mxu1 }
 0x3d6   : > { %v1309_v5 = vadd.f32 %v2087_v14, %v1308_v3 }
 0x3d8   : > { %v1327_v7 = vmax.f32 %v1309_v5, 0.0  ;;  %v1531_v5 = vpop.permute.xlu1 %1530 }
 0x3dd   : > { %v1310_v35 = vpop.f32.mrf.mxu1 }
 0x3de   : > { %v1311_v6 = vadd.f32 %v2087_v14, %v1310_v35  ;;  %v2790_v14 = vld [vmem:[%s2970_s15] ss:$0 sm:$0xff] }
 0x3e0   : > { %v1328_v8 = vmax.f32 %v1311_v6, 0.0 }
 0x3e2   : > { %v1336_v49 = vpack.c.bf16 %v1328_v8, %v1327_v7 }
 0x3e4   : > { %2007 = vmatmul.msk.bf16.gmra.mxu2 %vm700_vm1, %v1336_v49 }
 0x3f7   : > { %v1390_v16 = vpop.f32.mrf.mxu2 }
 0x3f8   : > { %v1391_v17 = vadd.f32 %v2790_v14, %v1390_v16 }
 0x3fa   : > { %v1430_v19 = vsub.f32 0.0, %v1391_v17 }
 0x3fc   : > { %v1446_v53 = vmul.f32 1.442695, %v1430_v19  ;;  %v1535_v19 = vpop.permute.xlu2 %1534 }
 0x3fe   : > { %2121 = vpow2.f32 %v1446_v53 }
 0x3ff   : > { %v1392_v39 = vpop.f32.mrf.mxu2 }
 0x400   : > { %v1393_v21 = vadd.f32 %v2790_v14, %v1392_v39 }
 0x402   : > { %v1431_v23 = vsub.f32 0.0, %v1393_v21 }
 0x404   : > { %v2122_v25 = vpop.eup %2121  ;;  %v1448_v26 = vmul.f32 1.442695, %v1431_v23 }
 0x405   : > { %v1478_v28 = vadd.f32 1.0, %v2122_v25  ;;  %v1533_v25 = vpop.permute.xlu1 %1532 }
 0x406   : > { %2123 = vpow2.f32 %v1448_v26 }
 0x407   : > { %2125 = vrcp.f32 %v1478_v28  ;;  %v1395_v30 = vpop.f32.mrf.mxu2 }
 0x408   : > { %v1396_v32 = vadd.f32 %v2790_v14, %v1395_v30 }
 0x40a   : > { %v1432_v41 = vsub.f32 0.0, %v1396_v32 }
 0x40c   : > { %v2124_v36 = vpop.eup %2123  ;;  %v1450_v38 = vmul.f32 1.442695, %v1432_v41 }
 0x40d   : > { %v2126_v43 = vpop.eup %2125  ;;  %v1479_v40 = vadd.f32 1.0, %v2124_v36 }
 0x40e   : > { %v1702_v42 = vsel %vm834_vm2, %v2126_v43, %v1527_v27  ;;  %2127 = vpow2.f32 %v1450_v38  ;;  %v1667_v38 = vpop.permute.xlu2 %1666  ;;  %v1663_v43 = vpop.permute.xlu0 %1662 }
 0x40f   : > { %v1719_v46 = vsel %vm1718_vm5, %v1702_v42, %v1591_v10  ;;  %2129 = vrcp.f32 %v1479_v40  ;;  %v1397_v48 = vpop.f32.mrf.mxu2 }
 0x410   : > { %v1736_v31 = vsel %vm1735_vm6, %v1719_v46, %v1655_v44  ;;  %v1398_v50 = vadd.f32 %v2790_v14, %v1397_v48 }
 0x411   : > { %v1753_v52 = vsel %vm1752_vm7, %v1736_v31, 0.0 }
 0x412   : > { %1769 = vst [vmem:[%s2817_s20] sm:$0xff] %v1753_v52  ;;  %v1433_v54 = vsub.f32 0.0, %v1398_v50 }
 0x414   : > { %v2128_v58 = vpop.eup %2127  ;;  %v1452_v45 = vmul.f32 1.442695, %v1433_v54 }
 0x415   : > { %v2130_v59 = vpop.eup %2129  ;;  %v1480_v61 = vadd.f32 1.0, %v2128_v58  ;;  %v1665_v58 = vpop.permute.xlu1 %1664 }
 0x416   : > { %v1703_v62 = vsel %vm834_vm2, %v2130_v59, %v1529_v60  ;;  %2131 = vpow2.f32 %v1452_v45  ;;  %v1669_v45 = vpop.permute.xlu0 %1668 }
 0x417   : > { %v1720_v33 = vsel %vm1718_vm5, %v1703_v62, %v1593_v11  ;;  %2133 = vrcp.f32 %v1480_v61  ;;  %v1400_v63 = vpop.f32.mrf.mxu2  ;;  %v1537_v62 = vpop.permute.xlu2 %1536 }
 0x418   : > { %v1737_v47 = vsel %vm1735_vm6, %v1720_v33, %v1657_v22  ;;  %v1401_v0 = vadd.f32 %v2790_v14, %v1400_v63 }
 0x419   : > { %v1754_v2 = vsel %vm1752_vm7, %v1737_v47, 0.0 }
 0x41a   : > { %1770 = vst [vmem:[%s2817_s20 + $0x8] sm:$0xff] %v1754_v2  ;;  %v1434_v3 = vsub.f32 0.0, %v1401_v0 }
 0x41c   : > { %v2132_v35 = vpop.eup %2131  ;;  %v1454_v6 = vmul.f32 1.442695, %v1434_v3 }
 0x41d   : > { %v2134_v7 = vpop.eup %2133  ;;  %v1481_v8 = vadd.f32 1.0, %v2132_v35 }
 0x41e   : > { %v1704_v49 = vsel %vm834_vm2, %v2134_v7, %v1531_v5  ;;  %2135 = vpow2.f32 %v1454_v6  ;;  %v1671_v5 = vpop.permute.xlu1 %1670 }
 0x41f   : > { %v1721_v10 = vsel %vm1718_vm5, %v1704_v49, %v2772_v4  ;;  %2137 = vrcp.f32 %v1481_v8  ;;  %v1402_v11 = vpop.f32.mrf.mxu2  ;;  %v1539_v8 = vpop.permute.xlu0 %1538 }
 0x420   : > { %v1738_v16 = vsel %vm1735_vm6, %v1721_v10, %v1659_v57  ;;  %v1403_v17 = vadd.f32 %v2790_v14, %v1402_v11 }
 0x421   : > { %v1755_v53 = vsel %vm1752_vm7, %v1738_v16, 0.0 }
 0x422   : > { %1771 = vst [vmem:[%s2817_s20 + $0x10] sm:$0xff] %v1755_v53  ;;  %v1435_v39 = vsub.f32 0.0, %v1403_v17 }
 0x424   : > { %v2136_v21 = vpop.eup %2135  ;;  %v1456_v22 = vmul.f32 1.442695, %v1435_v39  ;;  %v1673_v39 = vpop.permute.xlu2 %1672 }
 0x425   : > { %v2138_v23 = vpop.eup %2137  ;;  %v1482_v26 = vadd.f32 1.0, %v2136_v21 }
 0x426   : > { %v1705_v28 = vsel %vm834_vm2, %v2138_v23, %v1533_v25  ;;  %2139 = vpow2.f32 %v1456_v22  ;;  %v1541_v25 = vpop.permute.xlu1 %1540 }
 0x427   : > { %v1722_v4 = vsel %vm1718_vm5, %v1705_v28, %v2779_v12  ;;  %2141 = vrcp.f32 %v1482_v26  ;;  %v1405_v30 = vpop.f32.mrf.mxu2 }
 0x428   : > { %v1739_v32 = vsel %vm1735_vm6, %v1722_v4, %v1661_v1  ;;  %v1406_v41 = vadd.f32 %v2790_v14, %v1405_v30 }
 0x429   : > { %v1756_v27 = vsel %vm1752_vm7, %v1739_v32, 0.0 }
 0x42a   : > { %1772 = vst [vmem:[%s2817_s20 + $0x18] sm:$0xff] %v1756_v27  ;;  %v1436_v36 = vsub.f32 0.0, %v1406_v41 }
 0x42c   : > { %v2140_v40 = vpop.eup %2139  ;;  %v1458_v42 = vmul.f32 1.442695, %v1436_v36  ;;  %v1675_v36 = vpop.permute.xlu0 %1674 }
 0x42d   : > { %v2142_v44 = vpop.eup %2141  ;;  %v1483_v46 = vadd.f32 1.0, %v2140_v40 }
 0x42e   : > { %v1706_v48 = vsel %vm834_vm2, %v2142_v44, %v1535_v19  ;;  %2143 = vpow2.f32 %v1458_v42  ;;  %v1543_v42 = vpop.permute.xlu2 %1542 }
 0x42f   : > { %v1723_v12 = vsel %vm1718_vm5, %v1706_v48, %v2781_v13  ;;  %2145 = vrcp.f32 %v1483_v46  ;;  %v1407_v31 = vpop.f32.mrf.mxu2 }
 0x430   : > { %v1740_v50 = vsel %vm1735_vm6, %v1723_v12, %v1663_v43  ;;  %v1408_v52 = vadd.f32 %v2790_v14, %v1407_v31 }
 0x431   : > { %v1757_v54 = vsel %vm1752_vm7, %v1740_v50, 0.0 }
 0x432   : > { %1773 = vst [vmem:[%s2817_s20 + $0x20] sm:$0xff] %v1757_v54  ;;  %v1437_v57 = vsub.f32 0.0, %v1408_v52  ;;  %v1677_v54 = vpop.permute.xlu1 %1676 }
 0x434   : > { %v2144_v59 = vpop.eup %2143  ;;  %v1460_v60 = vmul.f32 1.442695, %v1437_v57 }
 0x435   : > { %v2146_v61 = vpop.eup %2145  ;;  %v1484_v33 = vadd.f32 1.0, %v2144_v59  ;;  %v1545_v59 = vpop.permute.xlu0 %1544 }
 0x436   : > { %v1707_v13 = vsel %vm834_vm2, %v2146_v61, %v1537_v62  ;;  %2147 = vpow2.f32 %v1460_v60 }
 0x437   : > { %v1724_v63 = vsel %vm1718_vm5, %v1707_v13, %v2774_v9  ;;  %2149 = vrcp.f32 %v1484_v33  ;;  %v1410_v47 = vpop.f32.mrf.mxu2 }
 0x438   : > { %v1741_v0 = vsel %vm1735_vm6, %v1724_v63, %v1665_v58  ;;  %v1411_v1 = vadd.f32 %v2790_v14, %v1410_v47 }
 0x439   : > { %v1758_v2 = vsel %vm1752_vm7, %v1741_v0, 0.0  ;;  %v1679_v0 = vpop.permute.xlu2 %1678 }
 0x43a   : > { %1774 = vst [vmem:[%s2817_s20 + $0x28] sm:$0xff] %v1758_v2  ;;  %v1438_v3 = vsub.f32 0.0, %v1411_v1 }
 0x43c   : > { %v2148_v35 = vpop.eup %2147  ;;  %v1462_v6 = vmul.f32 1.442695, %v1438_v3 }
 0x43d   : > { %v2150_v7 = vpop.eup %2149  ;;  %v1485_v49 = vadd.f32 1.0, %v2148_v35 }
 0x43e   : > { %v1708_v10 = vsel %vm834_vm2, %v2150_v7, %v1539_v8  ;;  %2151 = vpow2.f32 %v1462_v6 }
 0x43f   : > { %v1725_v9 = vsel %vm1718_vm5, %v1708_v10, %v2785_v56  ;;  %2153 = vrcp.f32 %v1485_v49  ;;  %v1412_v11 = vpop.f32.mrf.mxu2 }
 0x440   : > { %v1742_v16 = vsel %vm1735_vm6, %v1725_v9, %v1667_v38  ;;  %v1413_v17 = vadd.f32 %v2790_v14, %v1412_v11 }
 0x441   : > { %v1759_v19 = vsel %vm1752_vm7, %v1742_v16, 0.0 }
 0x442   : > { %1775 = vst [vmem:[%s2817_s20 + $0x30] sm:$0xff] %v1759_v19  ;;  %v1439_v53 = vsub.f32 0.0, %v1413_v17  ;;  %v1549_v19 = vpop.permute.xlu2 %1548 }
 0x444   : > { %v2152_v21 = vpop.eup %2151  ;;  %v1464_v22 = vmul.f32 1.442695, %v1439_v53  ;;  %v1551_v53 = vpop.permute.xlu0 %1550 }
 0x445   : > { %v2154_v23 = vpop.eup %2153  ;;  %v1486_v26 = vadd.f32 1.0, %v2152_v21 }
 0x446   : > { %v1709_v28 = vsel %vm834_vm2, %v2154_v23, %v1541_v25  ;;  %2155 = vpow2.f32 %v1464_v22 }
 0x447   : > { %v1726_v56 = vsel %vm1718_vm5, %v1709_v28, %v2792_v15  ;;  %2157 = vrcp.f32 %v1486_v26  ;;  %v1415_v4 = vpop.f32.mrf.mxu2 }
 0x448   : > { %v1743_v30 = vsel %vm1735_vm6, %v1726_v56, %v1669_v45  ;;  %v1416_v32 = vadd.f32 %v2790_v14, %v1415_v4 }
 0x449   : > { %v1760_v41 = vsel %vm1752_vm7, %v1743_v30, 0.0 }
 0x44a   : > { %1776 = vst [vmem:[%s2817_s20 + $0x38] sm:$0xff] %v1760_v41  ;;  %v1440_v27 = vsub.f32 0.0, %v1416_v32 }
 0x44c   : > { %v2156_v38 = vpop.eup %2155  ;;  %v1466_v43 = vmul.f32 1.442695, %v1440_v27  ;;  %v1557_v32 = vpop.permute.xlu0 %1556 }
 0x44d   : > { %v2158_v40 = vpop.eup %2157  ;;  %v1487_v44 = vadd.f32 1.0, %v2156_v38 }
 0x44e   : > { %v1710_v46 = vsel %vm834_vm2, %v2158_v40, %v1543_v42  ;;  %2159 = vpow2.f32 %v1466_v43 }
 0x44f   : > { %v1727_v15 = vsel %vm1718_vm5, %v1710_v46, %v2777_v37  ;;  %2161 = vrcp.f32 %v1487_v44  ;;  %v1417_v48 = vpop.f32.mrf.mxu2 }
 0x450   : > { %v1744_v12 = vsel %vm1735_vm6, %v1727_v15, %v1671_v5  ;;  %v1418_v31 = vadd.f32 %v2790_v14, %v1417_v48  ;;  %v1547_v5 = vpop.permute.xlu1 %1546 }
 0x451   : > { %v1761_v50 = vsel %vm1752_vm7, %v1744_v12, 0.0 }
 0x452   : > { %1777 = vst [vmem:[%s2817_s20 + $0x40] sm:$0xff] %v1761_v50  ;;  %v1441_v52 = vsub.f32 0.0, %v1418_v31 }
 0x454   : > { %v2160_v57 = vpop.eup %2159  ;;  %v1468_v58 = vmul.f32 1.442695, %v1441_v52 }
 0x455   : > { %v2162_v45 = vpop.eup %2161  ;;  %v1488_v60 = vadd.f32 1.0, %v2160_v57 }
 0x456   : > { %v1711_v61 = vsel %vm834_vm2, %v2162_v45, %v1545_v59  ;;  %2163 = vpow2.f32 %v1468_v58  ;;  %v1555_v58 = vpop.permute.xlu2 %1554 }
 0x457   : > { %v1728_v37 = vsel %vm1718_vm5, %v1711_v61, %v2797_v55  ;;  %2165 = vrcp.f32 %v1488_v60  ;;  %v1420_v62 = vpop.f32.mrf.mxu2 }
 0x458   : > { %v1745_v33 = vsel %vm1735_vm6, %v1728_v37, %v1673_v39  ;;  %v1421_v13 = vadd.f32 %v2790_v14, %v1420_v62  ;;  %v1553_v48 = vpop.permute.xlu1 %1552 }
 0x459   : > { %v1762_v63 = vsel %vm1752_vm7, %v1745_v33, 0.0 }
 0x45a   : > { %1778 = vst [vmem:[%s2817_s20 + $0x48] sm:$0xff] %v1762_v63  ;;  %v1442_v47 = vsub.f32 0.0, %v1421_v13 }
 0x45c   : > { %v2164_v1 = vpop.eup %2163  ;;  %v1470_v2 = vmul.f32 1.442695, %v1442_v47 }
 0x45d   : > { %v2166_v3 = vpop.eup %2165  ;;  %v1489_v35 = vadd.f32 1.0, %v2164_v1 }
 0x45e   : > { %v1712_v6 = vsel %vm834_vm2, %v2166_v3, %v1547_v5  ;;  %2167 = vpow2.f32 %v1470_v2  ;;  %v1685_v13 = vpop.permute.xlu2 %1684 }
 0x45f   : > { %v1729_v55 = vsel %vm1718_vm5, %v1712_v6, %v2799_v20  ;;  %2169 = vrcp.f32 %v1489_v35  ;;  %v1422_v7 = vpop.f32.mrf.mxu2 }
 0x460   : > { %v1746_v8 = vsel %vm1735_vm6, %v1729_v55, %v1675_v36  ;;  %v1423_v49 = vadd.f32 %v2790_v14, %v1422_v7  ;;  %v1683_v60 = vpop.permute.xlu1 %1682 }
 0x461   : > { %v1763_v10 = vsel %vm1752_vm7, %v1746_v8, 0.0 }
 0x462   : > { %1779 = vst [vmem:[%s2817_s20 + $0x50] sm:$0xff] %v1763_v10  ;;  %v1443_v9 = vsub.f32 0.0, %v1423_v49 }
 0x464   : > { %v2168_v11 = vpop.eup %2167  ;;  %v1472_v16 = vmul.f32 1.442695, %v1443_v9 }
 0x465   : > { %v2170_v17 = vpop.eup %2169  ;;  %v1490_v39 = vadd.f32 1.0, %v2168_v11 }
 0x466   : > { %v1713_v21 = vsel %vm834_vm2, %v2170_v17, %v1549_v19  ;;  %2171 = vpow2.f32 %v1472_v16 }
 0x467   : > { %v1730_v20 = vsel %vm1718_vm5, %v1713_v21, %v2783_v51  ;;  %2173 = vrcp.f32 %v1490_v39  ;;  %v1425_v22 = vpop.f32.mrf.mxu2 }
 0x468   : > { %v1747_v23 = vsel %vm1735_vm6, %v1730_v20, %v1677_v54  ;;  %v1426_v25 = vadd.f32 %v2790_v14, %v1425_v22 }
 0x469   : > { %v1764_v26 = vsel %vm1752_vm7, %v1747_v23, 0.0 }
 0x46a   : > { %1780 = vst [vmem:[%s2817_s20 + $0x58] sm:$0xff] %v1764_v26  ;;  %v1444_v28 = vsub.f32 0.0, %v1426_v25 }
 0x46c   : > { %v2172_v56 = vpop.eup %2171  ;;  %v1474_v4 = vmul.f32 1.442695, %v1444_v28 }
 0x46d   : > { %v2174_v30 = vpop.eup %2173  ;;  %v1491_v41 = vadd.f32 1.0, %v2172_v56 }
 0x46e   : > { %v1714_v27 = vsel %vm834_vm2, %v2174_v30, %v1551_v53  ;;  %2175 = vpow2.f32 %v1474_v4 }
 0x46f   : > { %v1731_v51 = vsel %vm1718_vm5, %v1714_v27, %v2802_v24  ;;  %2177 = vrcp.f32 %v1491_v41  ;;  %v1427_v36 = vpop.f32.mrf.mxu2  ;;  %v1681_v24 = vpop.permute.xlu0 %1680 }
 0x470   : > { %v1748_v38 = vsel %vm1735_vm6, %v1731_v51, %v1679_v0  ;;  %v1428_v43 = vadd.f32 %v2790_v14, %v1427_v36 }
 0x471   : > { %v1765_v40 = vsel %vm1752_vm7, %v1748_v38, 0.0 }
 0x472   : > { %1781 = vst [vmem:[%s2817_s20 + $0x60] sm:$0xff] %v1765_v40  ;;  %v1445_v42 = vsub.f32 0.0, %v1428_v43 }
 0x474   : > { %v2176_v44 = vpop.eup %2175  ;;  %v1476_v46 = vmul.f32 1.442695, %v1445_v42 }
 0x475   : > { %v2178_v15 = vpop.eup %2177  ;;  %v1492_v12 = vadd.f32 1.0, %v2176_v44 }
 0x476   : > { %v1715_v31 = vsel %vm834_vm2, %v2178_v15, %v1553_v48  ;;  %2179 = vpow2.f32 %v1476_v46 }
 0x477   : > { %v1732_v50 = vsel %vm1718_vm5, %v1715_v31, %v2804_v29  ;;  %2181 = vrcp.f32 %v1492_v12 }
 0x478   : > { %v1749_v14 = vsel %vm1735_vm6, %v1732_v50, %v1681_v24 }
 0x479   : > { %v1766_v52 = vsel %vm1752_vm7, %v1749_v14, 0.0 }
 0x47a   : > { %1782 = vst [vmem:[%s2817_s20 + $0x68] sm:$0xff] %v1766_v52 }
 0x47c   : > { %v2180_v54 = vpop.eup %2179 }
 0x47d   : > { %v2182_v57 = vpop.eup %2181  ;;  %v1493_v45 = vadd.f32 1.0, %v2180_v54 }
 0x47e   : > { %v1716_v59 = vsel %vm834_vm2, %v2182_v57, %v1555_v58 }
 0x47f   : > { %v1733_v61 = vsel %vm1718_vm5, %v1716_v59, %v2795_v18  ;;  %2183 = vrcp.f32 %v1493_v45 }
 0x480   : > { %v1750_v29 = vsel %vm1735_vm6, %v1733_v61, %v1683_v60 }
 0x481   : > { %v1767_v37 = vsel %vm1752_vm7, %v1750_v29, 0.0 }
 0x482   : > { %1783 = vst [vmem:[%s2817_s20 + $0x70] sm:$0xff] %v1767_v37 }
 0x485   : > { %v2184_v62 = vpop.eup %2183 }
 0x486   : > { %v1717_v33 = vsel %vm834_vm2, %v2184_v62, %v1557_v32 }
 0x487   : > { %v1734_v18 = vsel %vm1718_vm5, %v1717_v33, %v2808_v34 }
 0x488   : > { %v1751_v63 = vsel %vm1735_vm6, %v1734_v18, %v1685_v13 }
 0x489   : > { %v1768_v47 = vsel %vm1752_vm7, %v1751_v63, 0.0 }
 0x48a   : > { %1784 = vst [vmem:[%s2817_s20 + $0x78] sm:$0xff] %v1768_v47 }
 0x48b   : > { %2212 = shalt.err (!%p2209_p3)
}
 0x48c   : > { %s2252_s19 = smov 128   ;;  %s2253_s20 = smov 8  }
 0x48d   : > { %2038 = dma.vmem_to_hbm [thread:$0]  (%p2377_p5), %s1799_s26, 2048, %s1801_s29, %s1786_s25, %s2252_s19, %s2252_s19, %s2253_s20  }
 0x48e PF: > { %p2044_p4 = scmp.ge.s32.totalorder %s2247_s24, 2  ;;  %s1815_s28 = sand.u32 1, %s2235_s21  }
 0x48f   : > { %s1816_s2 = scalar_lea.sflag [#allocation3], %s1815_s28 }
 0x490   : > { %p2041_p7 = pnand %p2044_p4, %p2381_p6 }
 0x492   : > { %p2042_p8 = pneg %p2041_p7 }
 0x494   : > { %2230 = dma.done.wait (%p2042_p8), %s1816_s2, 2048  }
 0x495   : > { %2232 = vsyncadd (%p2042_p8), %s1816_s2, 4294965248  ;;  %s2987_s1 = sld [smem:[#allocation5_spill]]  ;;  %p26_p9 = scmp.ge.s32.totalorder %s2364_s27, 4  }
 0x496   : > { %s2988_s23 = sld [smem:[#allocation6_spill]]  ;;  %s2989_s21 = smov %s2239_s22 }
 0x497   : > { %s2991_s24 = smov %s2364_s27  ;;  %28 = sbr.rel (!%p26_p9) target bundleno = 8 (0x8), region = 122 }
 0x49b   : > { %s2990_s22 = smov %s2987_s1 }
 0x49c   :  { %1822 = vsyncpa [#allocation3], 1 }
 0x49d   :  { %1824 = vsyncpa [#allocation3 + $0x1], 1 }

</bundles_post_ra>
